<compile_context>
chip_gen: v6e
topology: v6e:2x2x1
jax: 0.10.0
libtpu: 0.0.40
codegen_flags: <defaults>
</compile_context>

<pallas_src>
import jax
import jax.numpy as jnp
from jax.experimental import pallas as pl
from jax.experimental.pallas import tpu as pltpu

# ---- model constants (from the PyTorch module) ------------------------------
F_e, F_u, F_xs, F_xt = 10, 10, 10, 2
F_MSG = F_e + F_xt                        # 12  (node_mlp_1 width)
F_HID = F_xs + 1 + 4 * F_MSG + F_u        # 69  (node_mlp_2 input width)
OUT_PAD = 128                             # lane-dense output width

_VMEM = pl.BlockSpec(memory_space=pltpu.MemorySpace.VMEM)
_HI = jax.lax.Precision.HIGHEST


# ================================ Pallas kernel ===============================
def _smodel_kernel(src_row_ref, tgt_col_ref, bs_col_ref,
                   x_s_ref, x_t_ref, e_ref, u_ref,
                   w1a_ref, b1a_ref, w1b_ref, b1b_ref,
                   w2a_ref, b2a_ref, w2b_ref, b2b_ref,
                   o_ref):
    n_s = x_s_ref.shape[0]
    n_t = x_t_ref.shape[0]
    n_e = e_ref.shape[0]
    n_b = u_ref.shape[0]
    f32 = jnp.float32

    def mm(a, b):
        return jnp.dot(a, b, preferred_element_type=f32, precision=_HI)

    def leaky(h):                                     # LeakyReLU(0.1)
        return jnp.where(h >= 0.0, h, 0.1 * h)

    # ---- one-hot index matrices: each built exactly once ---------------------
    oh_src = (jax.lax.broadcasted_iota(jnp.int32, (n_s, n_e), 0)
              == src_row_ref[...]).astype(f32)        # [N_s,E] scatter (reused x3)
    oh_tgt_g = (jax.lax.broadcasted_iota(jnp.int32, (n_e, n_t), 1)
                == tgt_col_ref[...]).astype(f32)      # [E,N_t] gather x_t[tgt]
    oh_bs_g = (jax.lax.broadcasted_iota(jnp.int32, (n_s, n_b), 1)
               == bs_col_ref[...]).astype(f32)        # [N_s,B] gather u[batch_s]

    # ---- node_mlp_1: Linear -> LeakyReLU(0.1) -> Linear -----------------------
    # fold w1a[:F_xt] into x_t BEFORE the gather (gather yields 12 lanes, not 2)
    w1a = w1a_ref[...]
    x_t_w = mm(x_t_ref[...], w1a[:F_xt, :])           # [N_t, 12]
    h1 = mm(oh_tgt_g, x_t_w) + mm(e_ref[...], w1a[F_xt:, :]) + b1a_ref[...]
    msg = mm(leaky(h1), w1b_ref[...]) + b1b_ref[...]  # [E, 12]

    # ---- fused segment scatter #1: [msg | msg^2 | 1] --------------------------
    ones = jnp.ones((n_e, 1), f32)
    stats1 = mm(oh_src, jnp.concatenate([msg, msg * msg, ones], axis=1))
    sum_msg = stats1[:, 0:F_MSG]                      # [N_s,12]
    sum_sq = stats1[:, F_MSG:2 * F_MSG]               # [N_s,12]
    count = stats1[:, 2 * F_MSG:2 * F_MSG + 1]        # [N_s,1]

    cnt = jnp.maximum(count, 1.0)                     # torch_scatter 'mean'
    inv_cnt = 1.0 / cnt                               # exact; reused 4x below
    mean = sum_msg * inv_cnt
    mean_sq = sum_sq * inv_cnt
    var = jnp.maximum(mean_sq - mean * mean, 0.0)     # relu (as in reference)
    denom = var + 1e-6
    std = jnp.sqrt(denom)
    inv_std = jax.lax.rsqrt(denom)                    # EUP; no f32 divides

    # ---- gather mean[src] by reusing the SAME one-hot, transposed (XLU) ------
    mean_g = mm(oh_src.T, mean)                       # [E, 12]
    d = msg - mean_g
    d2 = d * d

    # ---- fused segment scatter #2: [d^3 | d^4] --------------------------------
    stats2 = mm(oh_src, jnp.concatenate([d2 * d, d2 * d2], axis=1))
    inv_std2 = inv_std * inv_std
    skew = stats2[:, 0:F_MSG] * inv_cnt * (inv_std2 * inv_std)
    kurt = stats2[:, F_MSG:2 * F_MSG] * inv_cnt * (inv_std2 * inv_std2)

    # ---- gather u[batch_s] -----------------------------------------------------
    u_g = mm(oh_bs_g, u_ref[...])                     # [N_s, 10]

    # ---- node_mlp_2: single K=69 matmul, lane-dense padded output -------------
    h_cat = jnp.concatenate([x_s_ref[...], count, mean, std, skew, kurt, u_g],
                            axis=1)                   # [N_s, 69]
    h2 = mm(h_cat, w2a_ref[...]) + b2a_ref[...]       # [N_s, 10]
    o_ref[...] = mm(leaky(h2), w2b_ref[...]) + b2b_ref[...]   # [N_s, 128]


# =============================== host-side wrapper ============================
def smodel_forward(params, x_s, x_t, edge_index, edge_attr, u, batch_s):
    src, tgt = edge_index[0], edge_index[1]
    n_s = x_s.shape[0]
    n_e = edge_attr.shape[0]
    # index vectors in the layouts the one-hot builders need (src_col dropped:
    # the mean[src] gather reuses the scatter one-hot transposed).
    src_row = src.astype(jnp.int32).reshape(1, n_e)
    tgt_col = tgt.astype(jnp.int32).reshape(n_e, 1)
    bs_col = batch_s.astype(jnp.int32).reshape(n_s, 1)
    # TODO(synk): in the tiled large-graph design, deliver these via
    #   PrefetchScalarGridSpec (SMEM) instead of VMEM inputs.

    (w1a, b1a), (w1b, b1b) = params["mlp1"]["l1"], params["mlp1"]["l2"]
    (w2a, b2a), (w2b, b2b) = params["mlp2"]["l1"], params["mlp2"]["l2"]

    # lane-dense HBM writeback: pad the last layer to 128 output lanes (zeros),
    # slice the real F_xs columns after the call.
    w2b_p = jnp.zeros((w2b.shape[0], OUT_PAD), jnp.float32).at[:, :F_xs].set(w2b)
    b2b_p = jnp.zeros((1, OUT_PAD), jnp.float32).at[:, :F_xs].set(b2b)

    out = pl.pallas_call(
        _smodel_kernel,
        out_shape=jax.ShapeDtypeStruct((n_s, OUT_PAD), jnp.float32),
        in_specs=[_VMEM] * 15,
        out_specs=_VMEM,
    )(src_row, tgt_col, bs_col, x_s, x_t, edge_attr, u,
      w1a, b1a, w1b, b1b, w2a, b2a, w2b_p, b2b_p)
    return out[:, :F_xs]


# ============================ parameter initialisation ========================
def init_linear(key, din, dout):
    kw, kb = jax.random.split(key)
    bound = 1.0 / (din ** 0.5)
    w = jax.random.uniform(kw, (din, dout), jnp.float32, -bound, bound)
    b = jax.random.uniform(kb, (1, dout), jnp.float32, -bound, bound)
    return w, b


def init_mlp(key, din, dh, dout):
    k1, k2 = jax.random.split(key)
    return {"l1": init_linear(k1, din, dh), "l2": init_linear(k2, dh, dout)}


def init_params(key):
    k1, k2 = jax.random.split(key)
    return {"mlp1": init_mlp(k1, F_MSG, F_MSG, F_MSG),
            "mlp2": init_mlp(k2, F_HID, F_xs, F_xs)}


# ============================== pure-JAX reference ============================
def smodel_ref(params, x_s, x_t, edge_index, edge_attr, u, batch_s):
    src, tgt = edge_index[0], edge_index[1]

    def mlp(p, x):
        (w1, b1), (w2, b2) = p["l1"], p["l2"]
        h = jnp.dot(x, w1, precision=_HI) + b1
        h = jnp.where(h >= 0.0, h, 0.1 * h)
        return jnp.dot(h, w2, precision=_HI) + b2

    n_s = x_s.shape[0]

    def ssum(vals, idx):
        return jnp.zeros((n_s, vals.shape[1]), jnp.float32).at[idx].add(vals)

    msg = mlp(params["mlp1"], jnp.concatenate([x_t[tgt], edge_attr], axis=1))
    count = ssum(jnp.ones((msg.shape[0], 1), jnp.float32), src)
    cnt = jnp.maximum(count, 1.0)
    mean = ssum(msg, src) / cnt
    var = jnp.maximum(ssum(msg * msg, src) / cnt - mean * mean, 0.0)
    std = jnp.sqrt(var + 1e-6)
    d = msg - mean[src]
    skew = (ssum(d ** 3, src) / cnt) / std ** 3
    kurt = (ssum(d ** 4, src) / cnt) / std ** 4
    h = jnp.concatenate([x_s, count, mean, std, skew, kurt, u[batch_s]], axis=1)
    return mlp(params["mlp2"], h)


# ==================================== main ====================================
if __name__ == "__main__":
    key = jax.random.PRNGKey(0)
    k_par, k_xs, k_xt, k_e, k_u = jax.random.split(key, 5)

    B, N_s, N_t, E = 2, 8, 6, 16
    x_s = jax.random.normal(k_xs, (N_s, F_xs), jnp.float32)
    x_t = jax.random.normal(k_xt, (N_t, F_xt), jnp.float32)
    edge_attr = jax.random.normal(k_e, (E, F_e), jnp.float32)
    u = jax.random.normal(k_u, (B, F_u), jnp.float32)

    per = E // B  # 8 edges per graph
    src = jnp.concatenate([jnp.arange(per) % 4, 4 + jnp.arange(per) % 4]).astype(jnp.int32)
    tgt = jnp.concatenate([jnp.arange(per) % 3, 3 + jnp.arange(per) % 3]).astype(jnp.int32)
    edge_index = jnp.stack([src, tgt])
    batch_s = jnp.concatenate([jnp.zeros(4, jnp.int32), jnp.ones(4, jnp.int32)])

    params = init_params(k_par)

    fwd = jax.jit(smodel_forward)
    out = fwd(params, x_s, x_t, edge_index, edge_attr, u, batch_s)
    jax.block_until_ready(out)
    assert out.shape == (N_s, F_xs)

    ref = smodel_ref(params, x_s, x_t, edge_index, edge_attr, u, batch_s)
    err = float(jnp.max(jnp.abs(out - ref)))
    assert jnp.allclose(out, ref, atol=5e-3, rtol=5e-3), f"max abs err {err}"

    print("KERNEL_OK")
</pallas_src>

<mosaic_0001>
module attributes {stable_mosaic.version = 11 : i64} {
  func.func @_smodel_kernel(%arg0: memref<1x16xi32, #tpu.memory_space<vmem>>, %arg1: memref<16x1xi32, #tpu.memory_space<vmem>>, %arg2: memref<8x1xi32, #tpu.memory_space<vmem>>, %arg3: memref<8x10xf32, #tpu.memory_space<vmem>>, %arg4: memref<6x2xf32, #tpu.memory_space<vmem>>, %arg5: memref<16x10xf32, #tpu.memory_space<vmem>>, %arg6: memref<2x10xf32, #tpu.memory_space<vmem>>, %arg7: memref<12x12xf32, #tpu.memory_space<vmem>>, %arg8: memref<1x12xf32, #tpu.memory_space<vmem>>, %arg9: memref<12x12xf32, #tpu.memory_space<vmem>>, %arg10: memref<1x12xf32, #tpu.memory_space<vmem>>, %arg11: memref<69x10xf32, #tpu.memory_space<vmem>>, %arg12: memref<1x10xf32, #tpu.memory_space<vmem>>, %arg13: memref<10x128xf32, #tpu.memory_space<vmem>>, %arg14: memref<1x128xf32, #tpu.memory_space<vmem>>, %arg15: memref<8x128xf32, #tpu.memory_space<vmem>>) attributes {dimension_semantics = [], scalar_prefetch = 0 : i64, scratch_operands = 0 : i64, tpu.core_type = #tpu.core_type<tc>} {
    %0 = tpu.iota {dimensions = array<i32: 0>} : vector<8x16xi32>
    %c0 = arith.constant 0 : index
    %c0_0 = arith.constant 0 : index
    %1 = vector.load %arg0[%c0, %c0_0] : memref<1x16xi32, #tpu.memory_space<vmem>>, vector<1x16xi32>
    %2 = vector.broadcast %1 : vector<1x16xi32> to vector<8x16xi32>
    %3 = arith.cmpi eq, %0, %2 : vector<8x16xi32>
    %4 = arith.extui %3 : vector<8x16xi1> to vector<8x16xi32>
    %5 = arith.sitofp %4 : vector<8x16xi32> to vector<8x16xf32>
    %6 = tpu.iota {dimensions = array<i32: 1>} : vector<16x6xi32>
    %c0_1 = arith.constant 0 : index
    %c0_2 = arith.constant 0 : index
    %7 = vector.load %arg1[%c0_1, %c0_2] : memref<16x1xi32, #tpu.memory_space<vmem>>, vector<16x1xi32>
    %8 = vector.broadcast %7 : vector<16x1xi32> to vector<16x6xi32>
    %9 = arith.cmpi eq, %6, %8 : vector<16x6xi32>
    %10 = arith.extui %9 : vector<16x6xi1> to vector<16x6xi32>
    %11 = arith.sitofp %10 : vector<16x6xi32> to vector<16x6xf32>
    %12 = tpu.iota {dimensions = array<i32: 1>} : vector<8x2xi32>
    %c0_3 = arith.constant 0 : index
    %c0_4 = arith.constant 0 : index
    %13 = vector.load %arg2[%c0_3, %c0_4] : memref<8x1xi32, #tpu.memory_space<vmem>>, vector<8x1xi32>
    %14 = vector.broadcast %13 : vector<8x1xi32> to vector<8x2xi32>
    %15 = arith.cmpi eq, %12, %14 : vector<8x2xi32>
    %16 = arith.extui %15 : vector<8x2xi1> to vector<8x2xi32>
    %17 = arith.sitofp %16 : vector<8x2xi32> to vector<8x2xf32>
    %c0_5 = arith.constant 0 : index
    %c0_6 = arith.constant 0 : index
    %18 = vector.load %arg7[%c0_5, %c0_6] : memref<12x12xf32, #tpu.memory_space<vmem>>, vector<12x12xf32>
    %c0_7 = arith.constant 0 : index
    %c0_8 = arith.constant 0 : index
    %19 = vector.load %arg4[%c0_7, %c0_8] : memref<6x2xf32, #tpu.memory_space<vmem>>, vector<6x2xf32>
    %20 = vector.extract_strided_slice %18 {offsets = [0, 0], sizes = [2, 12], strides = [1, 1]} : vector<12x12xf32> to vector<2x12xf32>
    %cst = arith.constant dense<0.000000e+00> : vector<6x12xf32>
    %21 = tpu.matmul %19, %20, %cst {dimension_numbers = #tpu.dot_dimension_numbers<[1], [0], [0], [1], [0, 0, 1, 1], [], []>, precision = #tpu.contract_precision<fp32>} : vector<6x2xf32>, vector<2x12xf32>, vector<6x12xf32> -> vector<6x12xf32>
    %cst_9 = arith.constant dense<0.000000e+00> : vector<16x12xf32>
    %22 = tpu.matmul %11, %21, %cst_9 {dimension_numbers = #tpu.dot_dimension_numbers<[1], [0], [0], [1], [0, 0, 1, 1], [], []>, precision = #tpu.contract_precision<fp32>} : vector<16x6xf32>, vector<6x12xf32>, vector<16x12xf32> -> vector<16x12xf32>
    %c0_10 = arith.constant 0 : index
    %c0_11 = arith.constant 0 : index
    %23 = vector.load %arg5[%c0_10, %c0_11] : memref<16x10xf32, #tpu.memory_space<vmem>>, vector<16x10xf32>
    %24 = vector.extract_strided_slice %18 {offsets = [2, 0], sizes = [10, 12], strides = [1, 1]} : vector<12x12xf32> to vector<10x12xf32>
    %cst_12 = arith.constant dense<0.000000e+00> : vector<16x12xf32>
    %25 = tpu.matmul %23, %24, %cst_12 {dimension_numbers = #tpu.dot_dimension_numbers<[1], [0], [0], [1], [0, 0, 1, 1], [], []>, precision = #tpu.contract_precision<fp32>} : vector<16x10xf32>, vector<10x12xf32>, vector<16x12xf32> -> vector<16x12xf32>
    %26 = arith.addf %22, %25 : vector<16x12xf32>
    %c0_13 = arith.constant 0 : index
    %c0_14 = arith.constant 0 : index
    %27 = vector.load %arg8[%c0_13, %c0_14] : memref<1x12xf32, #tpu.memory_space<vmem>>, vector<1x12xf32>
    %28 = vector.broadcast %27 : vector<1x12xf32> to vector<16x12xf32>
    %29 = arith.addf %26, %28 : vector<16x12xf32>
    %cst_15 = arith.constant 0.000000e+00 : f32
    %30 = vector.broadcast %cst_15 : f32 to vector<16x12xf32>
    %31 = arith.cmpf oge, %29, %30 : vector<16x12xf32>
    %cst_16 = arith.constant 1.000000e-01 : f32
    %32 = vector.broadcast %cst_16 : f32 to vector<16x12xf32>
    %33 = arith.mulf %32, %29 : vector<16x12xf32>
    %34 = arith.select %31, %29, %33 : vector<16x12xi1>, vector<16x12xf32>
    %c0_17 = arith.constant 0 : index
    %c0_18 = arith.constant 0 : index
    %35 = vector.load %arg9[%c0_17, %c0_18] : memref<12x12xf32, #tpu.memory_space<vmem>>, vector<12x12xf32>
    %cst_19 = arith.constant dense<0.000000e+00> : vector<16x12xf32>
    %36 = tpu.matmul %34, %35, %cst_19 {dimension_numbers = #tpu.dot_dimension_numbers<[1], [0], [0], [1], [0, 0, 1, 1], [], []>, precision = #tpu.contract_precision<fp32>} : vector<16x12xf32>, vector<12x12xf32>, vector<16x12xf32> -> vector<16x12xf32>
    %c0_20 = arith.constant 0 : index
    %c0_21 = arith.constant 0 : index
    %37 = vector.load %arg10[%c0_20, %c0_21] : memref<1x12xf32, #tpu.memory_space<vmem>>, vector<1x12xf32>
    %38 = vector.broadcast %37 : vector<1x12xf32> to vector<16x12xf32>
    %39 = arith.addf %36, %38 : vector<16x12xf32>
    %cst_22 = arith.constant 1.000000e+00 : f32
    %40 = vector.broadcast %cst_22 : f32 to vector<16x1xf32>
    %41 = arith.mulf %39, %39 : vector<16x12xf32>
    %42 = tpu.concatenate %39, %41, %40 in 1 : vector<16x12xf32>, vector<16x12xf32>, vector<16x1xf32> -> vector<16x25xf32>
    %cst_23 = arith.constant dense<0.000000e+00> : vector<8x25xf32>
    %43 = tpu.matmul %5, %42, %cst_23 {dimension_numbers = #tpu.dot_dimension_numbers<[1], [0], [0], [1], [0, 0, 1, 1], [], []>, precision = #tpu.contract_precision<fp32>} : vector<8x16xf32>, vector<16x25xf32>, vector<8x25xf32> -> vector<8x25xf32>
    %44 = vector.extract_strided_slice %43 {offsets = [0, 0], sizes = [8, 12], strides = [1, 1]} : vector<8x25xf32> to vector<8x12xf32>
    %45 = vector.extract_strided_slice %43 {offsets = [0, 12], sizes = [8, 12], strides = [1, 1]} : vector<8x25xf32> to vector<8x12xf32>
    %46 = vector.extract_strided_slice %43 {offsets = [0, 24], sizes = [8, 1], strides = [1, 1]} : vector<8x25xf32> to vector<8x1xf32>
    %cst_24 = arith.constant 1.000000e+00 : f32
    %47 = vector.broadcast %cst_24 : f32 to vector<8x1xf32>
    %48 = arith.maximumf %46, %47 : vector<8x1xf32>
    %cst_25 = arith.constant 1.000000e+00 : f32
    %49 = vector.broadcast %cst_25 : f32 to vector<8x1xf32>
    %50 = arith.divf %49, %48 : vector<8x1xf32>
    %51 = vector.broadcast %50 : vector<8x1xf32> to vector<8x12xf32>
    %52 = arith.mulf %44, %51 : vector<8x12xf32>
    %53 = vector.broadcast %50 : vector<8x1xf32> to vector<8x12xf32>
    %54 = arith.mulf %45, %53 : vector<8x12xf32>
    %55 = arith.mulf %52, %52 : vector<8x12xf32>
    %56 = arith.subf %54, %55 : vector<8x12xf32>
    %cst_26 = arith.constant 0.000000e+00 : f32
    %57 = vector.broadcast %cst_26 : f32 to vector<8x12xf32>
    %58 = arith.maximumf %56, %57 : vector<8x12xf32>
    %cst_27 = arith.constant 9.99999997E-7 : f32
    %59 = vector.broadcast %cst_27 : f32 to vector<8x12xf32>
    %60 = arith.addf %58, %59 : vector<8x12xf32>
    %61 = math.sqrt %60 : vector<8x12xf32>
    %62 = math.rsqrt %60 : vector<8x12xf32>
    %63 = tpu.transpose %5, [1, 0] : vector<8x16xf32> -> vector<16x8xf32>
    %cst_28 = arith.constant dense<0.000000e+00> : vector<16x12xf32>
    %64 = tpu.matmul %63, %52, %cst_28 {dimension_numbers = #tpu.dot_dimension_numbers<[1], [0], [0], [1], [0, 0, 1, 1], [], []>, precision = #tpu.contract_precision<fp32>} : vector<16x8xf32>, vector<8x12xf32>, vector<16x12xf32> -> vector<16x12xf32>
    %65 = arith.subf %39, %64 : vector<16x12xf32>
    %66 = arith.mulf %65, %65 : vector<16x12xf32>
    %67 = arith.mulf %66, %65 : vector<16x12xf32>
    %68 = arith.mulf %66, %66 : vector<16x12xf32>
    %69 = tpu.concatenate %67, %68 in 1 : vector<16x12xf32>, vector<16x12xf32> -> vector<16x24xf32>
    %cst_29 = arith.constant dense<0.000000e+00> : vector<8x24xf32>
    %70 = tpu.matmul %5, %69, %cst_29 {dimension_numbers = #tpu.dot_dimension_numbers<[1], [0], [0], [1], [0, 0, 1, 1], [], []>, precision = #tpu.contract_precision<fp32>} : vector<8x16xf32>, vector<16x24xf32>, vector<8x24xf32> -> vector<8x24xf32>
    %71 = arith.mulf %62, %62 : vector<8x12xf32>
    %72 = vector.extract_strided_slice %70 {offsets = [0, 0], sizes = [8, 12], strides = [1, 1]} : vector<8x24xf32> to vector<8x12xf32>
    %73 = vector.broadcast %50 : vector<8x1xf32> to vector<8x12xf32>
    %74 = arith.mulf %72, %73 : vector<8x12xf32>
    %75 = arith.mulf %71, %62 : vector<8x12xf32>
    %76 = arith.mulf %74, %75 : vector<8x12xf32>
    %77 = vector.extract_strided_slice %70 {offsets = [0, 12], sizes = [8, 12], strides = [1, 1]} : vector<8x24xf32> to vector<8x12xf32>
    %78 = vector.broadcast %50 : vector<8x1xf32> to vector<8x12xf32>
    %79 = arith.mulf %77, %78 : vector<8x12xf32>
    %80 = arith.mulf %71, %71 : vector<8x12xf32>
    %81 = arith.mulf %79, %80 : vector<8x12xf32>
    %c0_30 = arith.constant 0 : index
    %c0_31 = arith.constant 0 : index
    %82 = vector.load %arg6[%c0_30, %c0_31] : memref<2x10xf32, #tpu.memory_space<vmem>>, vector<2x10xf32>
    %cst_32 = arith.constant dense<0.000000e+00> : vector<8x10xf32>
    %83 = tpu.matmul %17, %82, %cst_32 {dimension_numbers = #tpu.dot_dimension_numbers<[1], [0], [0], [1], [0, 0, 1, 1], [], []>, precision = #tpu.contract_precision<fp32>} : vector<8x2xf32>, vector<2x10xf32>, vector<8x10xf32> -> vector<8x10xf32>
    %c0_33 = arith.constant 0 : index
    %c0_34 = arith.constant 0 : index
    %84 = vector.load %arg3[%c0_33, %c0_34] : memref<8x10xf32, #tpu.memory_space<vmem>>, vector<8x10xf32>
    %85 = tpu.concatenate %84, %46, %52, %61, %76, %81, %83 in 1 : vector<8x10xf32>, vector<8x1xf32>, vector<8x12xf32>, vector<8x12xf32>, vector<8x12xf32>, vector<8x12xf32>, vector<8x10xf32> -> vector<8x69xf32>
    %c0_35 = arith.constant 0 : index
    %c0_36 = arith.constant 0 : index
    %86 = vector.load %arg11[%c0_35, %c0_36] : memref<69x10xf32, #tpu.memory_space<vmem>>, vector<69x10xf32>
    %cst_37 = arith.constant dense<0.000000e+00> : vector<8x10xf32>
    %87 = tpu.matmul %85, %86, %cst_37 {dimension_numbers = #tpu.dot_dimension_numbers<[1], [0], [0], [1], [0, 0, 1, 1], [], []>, precision = #tpu.contract_precision<fp32>} : vector<8x69xf32>, vector<69x10xf32>, vector<8x10xf32> -> vector<8x10xf32>
    %c0_38 = arith.constant 0 : index
    %c0_39 = arith.constant 0 : index
    %88 = vector.load %arg12[%c0_38, %c0_39] : memref<1x10xf32, #tpu.memory_space<vmem>>, vector<1x10xf32>
    %89 = vector.broadcast %88 : vector<1x10xf32> to vector<8x10xf32>
    %90 = arith.addf %87, %89 : vector<8x10xf32>
    %cst_40 = arith.constant 0.000000e+00 : f32
    %91 = vector.broadcast %cst_40 : f32 to vector<8x10xf32>
    %92 = arith.cmpf oge, %90, %91 : vector<8x10xf32>
    %cst_41 = arith.constant 1.000000e-01 : f32
    %93 = vector.broadcast %cst_41 : f32 to vector<8x10xf32>
    %94 = arith.mulf %93, %90 : vector<8x10xf32>
    %95 = arith.select %92, %90, %94 : vector<8x10xi1>, vector<8x10xf32>
    %c0_42 = arith.constant 0 : index
    %c0_43 = arith.constant 0 : index
    %96 = vector.load %arg13[%c0_42, %c0_43] : memref<10x128xf32, #tpu.memory_space<vmem>>, vector<10x128xf32>
    %cst_44 = arith.constant dense<0.000000e+00> : vector<8x128xf32>
    %97 = tpu.matmul %95, %96, %cst_44 {dimension_numbers = #tpu.dot_dimension_numbers<[1], [0], [0], [1], [0, 0, 1, 1], [], []>, precision = #tpu.contract_precision<fp32>} : vector<8x10xf32>, vector<10x128xf32>, vector<8x128xf32> -> vector<8x128xf32>
    %c0_45 = arith.constant 0 : index
    %c0_46 = arith.constant 0 : index
    %98 = vector.load %arg14[%c0_45, %c0_46] : memref<1x128xf32, #tpu.memory_space<vmem>>, vector<1x128xf32>
    %99 = vector.broadcast %98 : vector<1x128xf32> to vector<8x128xf32>
    %100 = arith.addf %97, %99 : vector<8x128xf32>
    %c0_47 = arith.constant 0 : index
    %c0_48 = arith.constant 0 : index
    %101 = vector.load %arg15[%c0_47, %c0_48] : memref<8x128xf32, #tpu.memory_space<vmem>>, vector<8x128xf32>
    tpu.vector_store %arg15[%c0_47, %c0_48], %100 {strides = array<i32>} : memref<8x128xf32, #tpu.memory_space<vmem>>, vector<8x128xf32>,
    return
  }
}

</mosaic_0001>

<bundles_post_ra>
// kernel: smodel_forward.1
= control target key start
LH: loop header
LB: loop body
LE: loop exit
PB: predicated region body
PF: predicated region fallthrough
CT: control target
= control target key end

     0   :  { %vm91_vm0 = vcmask 1041408   ;;  %v5912_v2 = vmov 0.0   ;;  %vm5913_vm1 = vmmov 0   ;;  %vm87_vm2 = vcmask 15360   ;;  %s6603_s0 = inlined_call_operand.vmem [shape: s32[1,16], index: 0, kind: input, shape index: {}]   ;;  %s6604_s1 = inlined_call_operand.vmem [shape: s32[16,1], index: 1, kind: input, shape index: {}]   ;;  %s6605_s2 = inlined_call_operand.vmem [shape: s32[8,1], index: 2, kind: input, shape index: {}]   ;;  %s6606_s3 = inlined_call_operand.vmem [shape: f32[8,10], index: 3, kind: input, shape index: {}]   ;;  %s6607_s4 = inlined_call_operand.vmem [shape: f32[6,2], index: 4, kind: input, shape index: {}]   ;;  %s6608_s5 = inlined_call_operand.vmem [shape: f32[16,10], index: 5, kind: input, shape index: {}]   ;;  %s6609_s6 = inlined_call_operand.vmem [shape: f32[2,10], index: 6, kind: input, shape index: {}]   ;;  %s6610_s7 = inlined_call_operand.vmem [shape: f32[12,12], index: 7, kind: input, shape index: {}]   ;;  %s6611_s8 = inlined_call_operand.vmem [shape: f32[1,12], index: 8, kind: input, shape index: {}]   ;;  %s6612_s9 = inlined_call_operand.vmem [shape: f32[12,12], index: 9, kind: input, shape index: {}]   ;;  %s6613_s10 = inlined_call_operand.vmem [shape: f32[1,12], index: 10, kind: input, shape index: {}]   ;;  %s6614_s11 = inlined_call_operand.vmem [shape: f32[69,10], index: 11, kind: input, shape index: {}]   ;;  %s6615_s12 = inlined_call_operand.vmem [shape: f32[1,10], index: 12, kind: input, shape index: {}]   ;;  %s6616_s13 = inlined_call_operand.vmem [shape: f32[10,128], index: 13, kind: input, shape index: {}]   ;;  %s6617_s14 = inlined_call_operand.vmem [shape: f32[1,128], index: 14, kind: input, shape index: {}]   ;;  %s6618_s15 = inlined_call_operand.hbm [shape: f32[8,128], index: 15, kind: output, shape index: {}]  }
   0x1   :  { %v6006_v0 = vld [vmem:[%s6610_s7] sm:$0xff]  ;;  %5415 = vmatprep.subr.mxu0 %v5912_v2  ;;  %5417 = vmatprep.mubr.msk.f32.mxu0 %vm5913_vm1, %v5912_v2  ;;  %v85_v7 = vld [vmem:[%s6610_s7 + $0x8] sm:$0xf] }
   0x2   :  { %v86_v1 = vld [vmem:[%s6607_s4] sm:$0x3f]  ;;  %v93_v3 = vsel %vm91_vm0, %v6006_v0, 0  ;;  %5420 = vmatprep.subr.mxu1 %v5912_v2  ;;  %5422 = vmatprep.mubr.msk.f32.mxu1 %vm5913_vm1, %v5912_v2 }
   0x3   :  { %v63_v4 = vld [vmem:[%s6604_s1] sm:$0xff]  ;;  %v126_v5 = vand.u32 4294901760, %v93_v3  ;;  %v89_v6 = vsel %vm87_vm2, %v86_v1, 0 }
   0x4   :  { %20 = vsyncpa [#allocation3], 0  ;;  %v161_v8 = vand.u32 4294901760, %v89_v6  ;;  %v5914_v9 = vmov 0   ;;  %v546_v10 = vrot.slane %v85_v7, 2  ;;  %v64_v13 = vld [vmem:[%s6604_s1 + $0x8] sm:$0xff]  ;;  %v51_v47 = vlaneseq }
   0x5   :  { %5882 = vset.pattern.permute.xlu0 %v5914_v9  ;;  %5416 = vmatpush3.msra.mxu0 %v126_v5  ;;  %v203_v11 = vsub.f32 %v93_v3, %v126_v5  ;;  %v545_v26 = vrot.slane %v6006_v0, 2  ;;  %vm544_vm3 = vcmask 1045504   ;;  %v541_v30 = vld [vmem:[%s6608_s5] sm:$0xff]  ;;  %vm549_vm4 = vcmask 80896   ;;  %v542_v33 = vld [vmem:[%s6608_s5 + $0x8] sm:$0xff]  ;;  %s5919_s4 = smov 11  }
   0x6   :  { %66 = vperm.xlu0 %5882, %v63_v4   ;;  %v162_v12 = vsub.f32 %v89_v6, %v161_v8  ;;  %5425 = vmatprep.subr.mxu0 %v5912_v2  ;;  %v556_v14 = vsel %vm91_vm0, %v546_v10, 0  ;;  %v551_v32 = vsel %vm549_vm4, %v541_v30, 0  ;;  %v554_v35 = vsel %vm549_vm4, %v542_v33, 0  ;;  %s5922_s25 = smov [#allocation2]  }
   0x7   :  { %v204_v15 = vand.u32 4294901760, %v203_v11  ;;  %v6032_v16 = vand.u32 4294901760, %v556_v14  ;;  %v547_v27 = vsel %vm544_vm3, %v545_v26, %v546_v10  ;;  %v625_v34 = vand.u32 4294901760, %v551_v32  ;;  %s5161_s26 = sshll.u32 %s5922_s25, 4  ;;  %s5162_s26 = int_to_ptr.vmem [resolvable:$true] %s5161_s26 }
   0x8   :  { %v163_v17 = vand.u32 4294901760, %v162_v12  ;;  %v590_v28 = vand.u32 4294901760, %v547_v27  ;;  %v635_v37 = vand.u32 4294901760, %v554_v35  ;;  %v6074_v48 = vand.u32 127, %v51_v47  ;;  %s5890_s1 = scalar_lea.vmem %s5162_s26, 128  ;;  %p5895_p1 = scmp.lt.s32.totalorder %s5162_s26, %s5162_s26 }
   0x9   :  { %v205_v18 = vsub.f32 %v203_v11, %v204_v15  ;;  %v6035_v19 = vsub.f32 %v556_v14, %v6032_v16  ;;  %v626_v38 = vsub.f32 %v551_v32, %v625_v34  ;;  %vm1060_vm5 = vcmask 48128   ;;  %p5891_p0 = scmp.ne.s32.totalorder %s5162_s26, %s5890_s1  ;;  %p5896_p2 = scmp.lt.s32.totalorder %s5890_s1, %s5890_s1 }
   0xa   :  { %69 = vperm.xlu0 %5882, %v64_v13   ;;  %v164_v20 = vsub.f32 %v162_v12, %v163_v17  ;;  %v682_v29 = vsub.f32 %v547_v27, %v590_v28  ;;  %v636_v40 = vsub.f32 %v554_v35, %v635_v37  ;;  %vm1590_vm8 = vcmask 1043456   ;;  %v1574_v27 = vld [vmem:[%s6612_s9] sm:$0xff] }
   0xb   :  { %v206_v21 = vand.u32 4294901760, %v205_v18  ;;  %v6038_v22 = vand.u32 4294901760, %v6035_v19  ;;  %v627_v41 = vand.u32 4294901760, %v626_v38  ;;  %vm1583_vm10 = vcmask 97280   ;;  %p5897_p3 = por %p5896_p2, %p5895_p1 }
   0xc   :  { %v165_v23 = vand.u32 4294901760, %v164_v20  ;;  %v683_v31 = vand.u32 4294901760, %v682_v29  ;;  %v637_v42 = vand.u32 4294901760, %v636_v40  ;;  %vm2111_vm13 = vcmask 130048  }
   0xd   :  { %5421 = vmatpush3.msra.mxu1 %v206_v21  ;;  %v677_v24 = vsub.f32 %v6035_v19, %v6038_v22  ;;  %v628_v43 = vsub.f32 %v626_v38, %v627_v41  ;;  %vm2108_vm14 = vcmask 195584   ;;  %vm2631_vm15 = vcmask 64512   ;;  %p5898_p4 = pnand %p5897_p3, %p5891_p0 }
   0xe   :  { %5418 = vmatmul.mubr.f32.vlgmr.msra.gmra.mxu0 %v165_v23  ;;  %5423 = vmatmul.mubr.f32.vlgmr.msra.gmra.mxu1 %v161_v8  ;;  %v684_v36 = vsub.f32 %v682_v29, %v683_v31  ;;  %v638_v44 = vsub.f32 %v636_v40, %v637_v42 }
   0xf   :  { %5426 = vmatpush3.msra.mxu0 %v203_v11  ;;  %5427 = vmatprep.mubr.msk.f32.mxu0 %vm5913_vm1, %v5912_v2  ;;  %v678_v25 = vand.u32 4294901760, %v677_v24  ;;  %v629_v45 = vand.u32 4294901760, %v628_v43  ;;  %v1575_v24 = vld [vmem:[%s6612_s9 + $0x8] sm:$0xf] }
  0x10   :  { %5430 = vmatprep.subr.mxu1 %v5912_v2  ;;  %5432 = vmatprep.mubr.msk.f32.mxu1 %vm5913_vm1, %v5912_v2  ;;  %v685_v39 = vand.u32 4294901760, %v684_v36  ;;  %v639_v46 = vand.u32 4294901760, %v638_v44 }
  0x11   :  { %5431 = vmatpush3.msra.mxu1 %v126_v5  ;;  %5435 = vmatprep.subr.mxu0 %v5912_v2 }
  0x12   :  { %5428 = vmatmul.mubr.f32.vlgmr.msra.gmra.mxu0 %v162_v12  ;;  %5433 = vmatmul.mubr.f32.vlgmr.msra.gmra.mxu1 %v163_v17 }
  0x13   :  { %5436 = vmatpush3.msra.mxu0 %v204_v15  ;;  %5437 = vmatprep.mubr.msk.f32.mxu0 %vm5913_vm1, %v5912_v2 }
  0x14   :  { %5440 = vmatprep.subr.mxu1 %v5912_v2  ;;  %5442 = vmatprep.mubr.msk.f32.mxu1 %vm5913_vm1, %v5912_v2 }
  0x15   :  { %5441 = vmatpush3.msra.mxu1 %v126_v5  ;;  %5445 = vmatprep.subr.mxu0 %v6032_v16 }
  0x16   :  { %5438 = vmatmul.mubr.f32.vlgmr.msra.gmra.mxu0 %v161_v8  ;;  %5443 = vmatmul.mubr.f32.vlgmr.msra.gmra.mxu1 %v161_v8 }
  0x17   :  { %5452 = vmatprep.subr.mxu1 %v678_v25  ;;  %5446 = vmatpush3.msra.mxu0 %v6032_v16 }
  0x18   :  { %5453 = vmatpush3.msra.mxu1 %v678_v25  ;;  %5447 = vmatprep.subr.mxu0 %v590_v28  ;;  %v1592_v25 = vsel %vm1590_vm8, %v1575_v24, 0  ;;  %vm4095_vm8 = vcmask 187392  }
  0x19   :  { %5448 = vmatpush3.msra.mxu0 %v590_v28  ;;  %5456 = vmatprep.mubr.f32.mxu1 %v625_v34  ;;  %v6092_v26 = vand.u32 4294901760, %v1592_v25 }
  0x1a   :  { %5459 = vmatprep.subr.mxu0 %v6035_v19  ;;  %5454 = vmatprep.subr.mxu1 %v685_v39 }
  0x1b   :  { %5455 = vmatpush3.msra.mxu1 %v685_v39  ;;  %5449 = vmatprep.mubr.f32.mxu0 %v629_v45 }
  0x1c   :  { %5457 = vmatmul.mubr.f32.vlgmr.msra.gmra.mxu1 %v635_v37  ;;  %5466 = vmatprep.subr.mxu1 %v6032_v16 }
  0x1d   :  { %5467 = vmatpush3.msra.mxu1 %v6032_v16  ;;  %5470 = vmatprep.mubr.f32.mxu1 %v627_v41 }
  0x1e   :  { %5468 = vmatprep.subr.mxu1 %v590_v28  ;;  %5450 = vmatmul.mubr.f32.vlgmr.msra.gmra.mxu0 %v639_v46 }
  0x1f   :  { %5469 = vmatpush3.msra.mxu1 %v590_v28  ;;  %5460 = vmatpush3.msra.mxu0 %v6035_v19 }
  0x20   :  { %5471 = vmatmul.mubr.f32.vlgmr.msra.gmra.mxu1 %v637_v42  ;;  %5480 = vmatprep.subr.mxu1 %v6032_v16 }
  0x21   :  { %5481 = vmatpush3.msra.mxu1 %v6032_v16  ;;  %5461 = vmatprep.subr.mxu0 %v682_v29 }
  0x22   :  { %5482 = vmatprep.subr.mxu1 %v590_v28  ;;  %5462 = vmatpush3.msra.mxu0 %v682_v29  ;;  %v6100_v29 = vand.u32 4294901760, %v1574_v27 }
  0x23   :  { %5463 = vmatprep.mubr.f32.mxu0 %v626_v38  ;;  %5483 = vmatpush3.msra.mxu1 %v590_v28  ;;  %v6098_v28 = vsub.f32 %v1592_v25, %v6092_v26 }
  0x24   :  { %5484 = vmatprep.mubr.f32.mxu1 %v625_v34  ;;  %5464 = vmatmul.mubr.f32.vlgmr.msra.gmra.mxu0 %v636_v40 }
  0x25   :  { %5473 = vmatprep.subr.mxu0 %v6038_v22  ;;  %5485 = vmatmul.mubr.f32.vlgmr.msra.gmra.mxu1 %v635_v37  ;;  %v6105_v30 = vand.u32 4294901760, %v6098_v28 }
  0x26   :  { %5474 = vmatpush3.msra.mxu0 %v6038_v22  ;;  %5477 = vmatprep.mubr.f32.mxu0 %v625_v34 }
  0x27   :  { %5475 = vmatprep.subr.mxu0 %v683_v31  ;;  %v1713_v32 = vsub.f32 %v6098_v28, %v6105_v30 }
  0x28   :  { %5476 = vmatpush3.msra.mxu0 %v683_v31  ;;  %v6108_v31 = vsub.f32 %v1574_v27, %v6100_v29 }
  0x29   :  { %5478 = vmatmul.mubr.f32.vlgmr.msra.gmra.mxu0 %v635_v37  ;;  %v1714_v34 = vand.u32 4294901760, %v1713_v32 }
  0x2a   :  { %v6115_v33 = vand.u32 4294901760, %v6108_v31 }
  0x2c   :  { %v1720_v35 = vsub.f32 %v6108_v31, %v6115_v33 }
  0x2e   :  { %v1721_v36 = vand.u32 4294901760, %v1720_v35 }
  0x81   :  { %v67_v49 = vpop.permute.xlu0 %66 }
  0x82   :  { %vm71_vm6 = vcmp.eq.s32.totalorder %v6074_v48, %v67_v49 }
  0x83   :  { %v5171_v50 = vsel %vm71_vm6, 1.0, %v5912_v2  ;;  %vm4123_vm6 = vcmask 1044480  }
  0x84   :  { %v1062_v51 = vsel %vm1060_vm5, %v5171_v50, 0  ;;  %5494 = vmatprep.mubr.msk.f32.mxu1 %vm1060_vm5, %v5171_v50 }
  0x85   :  { %v1137_v52 = vsub.f32 %v1062_v51, %v1062_v51  ;;  %v70_v56 = vpop.permute.xlu0 %69 }
  0x86   :  { %vm72_vm7 = vcmp.eq.s32.totalorder %v6074_v48, %v70_v56 }
  0x87   :  { %v1138_v53 = vand.u32 4294901760, %v1137_v52  ;;  %v5172_v57 = vsel %vm72_vm7, 1.0, %v5912_v2  ;;  %vm4093_vm7 = vcmask 89088  }
  0x88   :  { %v1065_v58 = vsel %vm1060_vm5, %v5172_v57, 0 }
  0x89   :  { %v1139_v54 = vsub.f32 %v1137_v52, %v1138_v53  ;;  %v1147_v0 = vsub.f32 %v1065_v58, %v1065_v58 }
  0x8b   :  { %v1140_v55 = vand.u32 4294901760, %v1139_v54  ;;  %v1148_v7 = vand.u32 4294901760, %v1147_v0 }
  0x8d   :  { %5489 = vmatprep.mubr.f32.mxu0 %v1140_v55  ;;  %v1149_v15 = vsub.f32 %v1147_v0, %v1148_v7 }
  0x8f   :  { %v1150_v19 = vand.u32 4294901760, %v1149_v15 }
  0xce   :  { %v167_v59 = vpop.f32.mrf.mxu0  ;;  %v243_v60 = vpop.f32.mrf.mxu1 }
  0xcf   :  { %v244_v61 = vadd.f32 %v243_v60, %v167_v59 }
  0xd0   :  { %v5419_v62 = vpop.f32.mrf.mxu0  ;;  %v5424_v63 = vpop.f32.mrf.mxu1 }
  0xd2   :  { %v317_v1 = vpop.f32.mrf.mxu0  ;;  %v391_v3 = vpop.f32.mrf.mxu1 }
  0xd3   :  { %v318_v4 = vadd.f32 %v317_v1, %v244_v61 }
  0xd4   :  { %v5429_v5 = vpop.f32.mrf.mxu0  ;;  %v5434_v6 = vpop.f32.mrf.mxu1 }
  0xd5   :  { %v392_v8 = vadd.f32 %v391_v3, %v318_v4 }
  0xd6   :  { %v465_v10 = vpop.f32.mrf.mxu0  ;;  %v537_v11 = vpop.f32.mrf.mxu1 }
  0xd7   :  { %v466_v12 = vadd.f32 %v465_v10, %v392_v8 }
  0xd8   :  { %v5439_v13 = vpop.f32.mrf.mxu0  ;;  %v5444_v14 = vpop.f32.mrf.mxu1 }
  0xd9   :  { %v538_v16 = vadd.f32 %v537_v11, %v466_v12 }
  0xdb   :  { %v1068_v17 = vsel %vm544_vm3, %v538_v16, 0 }
  0xdc   :  { %v1101_v18 = vand.u32 4294901760, %v1068_v17  ;;  %v5458_v39 = vpop.f32.mrf.mxu1 }
  0xde   :  { %v1188_v20 = vsub.f32 %v1068_v17, %v1101_v18  ;;  %5487 = vmatprep.subr.mxu0 %v1101_v18  ;;  %v5451_v37 = vpop.f32.mrf.mxu0  ;;  %v722_v41 = vpop.f32.mrf.mxu1 }
  0xdf   :  { %5488 = vmatpush3.msra.mxu0 %v1101_v18  ;;  %v729_v42 = vadd.f32 %v5458_v39, %v5451_v37 }
  0xe0   :  { %5490 = vmatmul.mubr.f32.vlgmr.msra.gmra.mxu0 %v1150_v19  ;;  %5497 = vmatprep.subr.mxu0 %v1188_v20  ;;  %v1189_v21 = vand.u32 4294901760, %v1188_v20  ;;  %v631_v38 = vpop.f32.mrf.mxu0  ;;  %v5472_v45 = vpop.f32.mrf.mxu1  ;;  %v5180_v19 = vld [vmem:[%s6611_s8] ss:$0 sm:$0xff] }
  0xe1   :  { %5498 = vmatpush3.msra.mxu0 %v1188_v20  ;;  %5499 = vmatprep.mubr.f32.mxu0 %v1137_v52  ;;  %v723_v44 = vadd.f32 %v722_v41, %v631_v38 }
  0xe2   :  { %5507 = vmatprep.subr.mxu0 %v1189_v21  ;;  %v1190_v22 = vsub.f32 %v1188_v20, %v1189_v21  ;;  %v886_v51 = vpop.f32.mrf.mxu1 }
  0xe4   :  { %5500 = vmatmul.mubr.f32.vlgmr.msra.gmra.mxu0 %v1147_v0  ;;  %v1191_v23 = vand.u32 4294901760, %v1190_v22  ;;  %v5465_v40 = vpop.f32.mrf.mxu0 }
  0xe5   :  { %5508 = vmatpush3.msra.mxu0 %v1189_v21  ;;  %5509 = vmatprep.mubr.msk.f32.mxu0 %vm1060_vm5, %v5171_v50  ;;  %v812_v46 = vadd.f32 %v5465_v40, %v729_v42  ;;  %v5486_v55 = vpop.f32.mrf.mxu1 }
  0xe6   :  { %5492 = vmatprep.subr.mxu1 %v1191_v23  ;;  %5517 = vmatprep.subr.mxu0 %v6092_v26  ;;  %v804_v43 = vpop.f32.mrf.mxu0 }
  0xe7   :  { %5493 = vmatpush3.msra.mxu1 %v1191_v23  ;;  %v895_v52 = vadd.f32 %v5472_v45, %v812_v46  ;;  %v1050_v59 = vpop.f32.mrf.mxu1 }
  0xe8   :  { %5495 = vmatmul.mubr.msk.f32.vlgmr.msra.gmra.mxu1 %vm1060_vm5, %v5172_v57  ;;  %5502 = vmatprep.subr.mxu1 %v1101_v18 }
  0xe9   :  { %5510 = vmatmul.mubr.msk.f32.vlgmr.msra.gmra.mxu0 %vm1060_vm5, %v5172_v57  ;;  %5503 = vmatpush3.msra.mxu1 %v1101_v18  ;;  %v5479_v49 = vpop.f32.mrf.mxu0 }
  0xea   :  { %5504 = vmatprep.mubr.f32.mxu1 %v1138_v53  ;;  %5512 = vmatprep.subr.mxu1 %v1101_v18  ;;  %v978_v56 = vadd.f32 %v5479_v49, %v895_v52 }
  0xeb   :  { %5518 = vmatpush3.msra.mxu0 %v6092_v26  ;;  %v971_v53 = vpop.f32.mrf.mxu0 }
  0xec   :  { %5505 = vmatmul.mubr.f32.vlgmr.msra.gmra.mxu1 %v1148_v7  ;;  %5519 = vmatprep.subr.mxu0 %v6100_v29  ;;  %v1057_v61 = vadd.f32 %v5486_v55, %v978_v56 }
  0xed   :  { %5513 = vmatpush3.msra.mxu1 %v1101_v18  ;;  %5514 = vmatprep.mubr.msk.f32.mxu1 %vm1060_vm5, %v5171_v50  ;;  %v805_v50 = vadd.f32 %v804_v43, %v723_v44 }
  0xee   :  { %5520 = vmatpush3.msra.mxu0 %v6100_v29  ;;  %5524 = vmatprep.subr.mxu1 %v1714_v34 }
  0xef   :  { %5531 = vmatprep.subr.mxu0 %v6098_v28  ;;  %v887_v54 = vadd.f32 %v886_v51, %v805_v50 }
  0xf0   :  { %5515 = vmatmul.mubr.msk.f32.vlgmr.msra.gmra.mxu1 %vm1060_vm5, %v5172_v57 }
  0xf1   :  { %5525 = vmatpush3.msra.mxu1 %v1714_v34  ;;  %v972_v58 = vadd.f32 %v971_v53, %v887_v54 }
  0xf2   :  { %5526 = vmatprep.subr.mxu1 %v1721_v36 }
  0xf3   :  { %5527 = vmatpush3.msra.mxu1 %v1721_v36  ;;  %v1051_v63 = vadd.f32 %v1050_v59, %v972_v58 }
  0xf4   :  { %5538 = vmatprep.subr.mxu1 %v6092_v26 }
 0x1a0   :  { %v5491_v57 = vpop.f32.mrf.mxu0 }
 0x1a1   :  { %v1153_v0 = vadd.f32 %v5491_v57, %v1057_v61 }
 0x1a2   :  { %v1142_v60 = vpop.f32.mrf.mxu0 }
 0x1a3   :  { %v1143_v4 = vadd.f32 %v1142_v60, %v1051_v63 }
 0x1a4   :  { %v5501_v62 = vpop.f32.mrf.mxu0 }
 0x1a6   :  { %v1308_v1 = vpop.f32.mrf.mxu0 }
 0x1a8   :  { %v5496_v3 = vpop.f32.mrf.mxu1 }
 0x1a9   :  { %v1235_v5 = vadd.f32 %v5496_v3, %v1153_v0  ;;  %v5511_v10 = vpop.f32.mrf.mxu0 }
 0x1aa   :  { %v1228_v6 = vpop.f32.mrf.mxu1 }
 0x1ab   :  { %v1229_v7 = vadd.f32 %v1228_v6, %v1143_v4  ;;  %v1316_v8 = vadd.f32 %v5501_v62, %v1235_v5  ;;  %v1471_v17 = vpop.f32.mrf.mxu0 }
 0x1ac   :  { %v5506_v11 = vpop.f32.mrf.mxu1 }
 0x1ad   :  { %v1398_v12 = vadd.f32 %v5506_v11, %v1316_v8  ;;  %v1309_v13 = vadd.f32 %v1308_v1, %v1229_v7  ;;  %v52_v8 = vshrl.u32 %v51_v47, 7 }
 0x1ae   :  { %v1389_v14 = vpop.f32.mrf.mxu1 }
 0x1af   :  { %v1390_v15 = vadd.f32 %v1389_v14, %v1309_v13  ;;  %v1478_v16 = vadd.f32 %v5511_v10, %v1398_v12  ;;  %v5169_v10 = vld [vmem:[%s6603_s0] ss:$0 sm:$0xff]  ;;  %s5921_s0 = smov 59  }
 0x1b0   :  { %v5516_v18 = vpop.f32.mrf.mxu1  ;;  %vm58_vm12 = vcmp.eq.s32.totalorder %v52_v8, %v5169_v10 }
 0x1b1   :  { %v1556_v20 = vadd.f32 %v5516_v18, %v1478_v16  ;;  %v1472_v21 = vadd.f32 %v1471_v17, %v1390_v15  ;;  %v6164_v11 = vsel %vm58_vm12, 1.0, %v5912_v2  ;;  %vm4119_vm12 = vcmask 564224  }
 0x1b2   :  { %v1549_v22 = vpop.f32.mrf.mxu1  ;;  %v2113_v12 = vsel %vm2111_vm13, %v6164_v11, 0 }
 0x1b3   :  { %v1567_v23 = vadd.f32 %v5180_v19, %v1556_v20  ;;  %v1550_v24 = vadd.f32 %v1549_v22, %v1472_v21  ;;  %v6169_v13 = vsub.f32 %v2113_v12, %v2113_v12 }
 0x1b5   :  { %vm1569_vm9 = vcmp.ge.f32.partialorder %v1567_v23, 0.0  ;;  %v1571_v25 = vmul.f32 0.1, %v1567_v23  ;;  %v1566_v27 = vadd.f32 %v5180_v19, %v1550_v24  ;;  %v6172_v14 = vand.u32 4294901760, %v6169_v13 }
 0x1b7   :  { %v1573_v32 = vsel %vm1569_vm9, %v1567_v23, %v1571_v25  ;;  %vm1568_vm11 = vcmp.ge.f32.partialorder %v1566_v27, 0.0  ;;  %v1570_v34 = vmul.f32 0.1, %v1566_v27  ;;  %v2185_v17 = vsub.f32 %v6169_v13, %v6172_v14 }
 0x1b8   :  { %v1588_v35 = vsel %vm1583_vm10, %v1573_v32, 0  ;;  %vm4097_vm9 = vcmask 285696  }
 0x1b9   :  { %v1572_v36 = vsel %vm1568_vm11, %v1566_v27, %v1570_v34  ;;  %v1671_v37 = vand.u32 4294901760, %v1588_v35  ;;  %v6181_v23 = vand.u32 4294901760, %v2185_v17  ;;  %vm4101_vm11 = vcmask 482304  }
 0x1ba   :  { %v1585_v38 = vsel %vm1583_vm10, %v1572_v36, 0 }
 0x1bb   :  { %v1661_v39 = vand.u32 4294901760, %v1585_v38  ;;  %v1672_v40 = vsub.f32 %v1588_v35, %v1671_v37 }
 0x1bd   :  { %5528 = vmatprep.mubr.f32.mxu1 %v1661_v39  ;;  %v1662_v41 = vsub.f32 %v1585_v38, %v1661_v39  ;;  %v1673_v42 = vand.u32 4294901760, %v1672_v40  ;;  %v5916_v38 = vmov 24  }
 0x1be   :  { %5529 = vmatmul.mubr.f32.vlgmr.msra.gmra.mxu1 %v1671_v37  ;;  %5883 = vset.pattern.permute.xlu0 %v5916_v38 }
 0x1bf   :  { %5539 = vmatpush3.msra.mxu1 %v6092_v26  ;;  %v1663_v43 = vand.u32 4294901760, %v1662_v41  ;;  %v1674_v44 = vsub.f32 %v1672_v40, %v1673_v42 }
 0x1c0   :  { %5540 = vmatprep.subr.mxu1 %v6100_v29 }
 0x1c1   :  { %5541 = vmatpush3.msra.mxu1 %v6100_v29  ;;  %5542 = vmatprep.mubr.f32.mxu1 %v1663_v43  ;;  %v1664_v45 = vsub.f32 %v1662_v41, %v1663_v43  ;;  %v1675_v49 = vand.u32 4294901760, %v1674_v44 }
 0x1c2   :  { %5543 = vmatmul.mubr.f32.vlgmr.msra.gmra.mxu1 %v1673_v42  ;;  %5552 = vmatprep.subr.mxu1 %v6092_v26 }
 0x1c3   :  { %5553 = vmatpush3.msra.mxu1 %v6092_v26  ;;  %5556 = vmatprep.mubr.f32.mxu1 %v1661_v39  ;;  %v1665_v46 = vand.u32 4294901760, %v1664_v45 }
 0x1c4   :  { %5554 = vmatprep.subr.mxu1 %v6100_v29 }
 0x1c5   :  { %5521 = vmatprep.mubr.f32.mxu0 %v1665_v46  ;;  %5555 = vmatpush3.msra.mxu1 %v6100_v29  ;;  %v5181_v29 = vld [vmem:[%s6613_s10] ss:$0 sm:$0xff]  ;;  %s5915_s10 = smov 12  }
 0x1c6   :  { %5522 = vmatmul.mubr.f32.vlgmr.msra.gmra.mxu0 %v1675_v49  ;;  %5557 = vmatmul.mubr.f32.vlgmr.msra.gmra.mxu1 %v1671_v37 }
 0x1c7   :  { %5532 = vmatpush3.msra.mxu0 %v6098_v28  ;;  %5535 = vmatprep.mubr.f32.mxu0 %v1662_v41 }
 0x1c8   :  { %5533 = vmatprep.subr.mxu0 %v6108_v31  ;;  %5566 = vmatprep.subr.mxu1 %v5912_v2 }
 0x1c9   :  { %5534 = vmatpush3.msra.mxu0 %v6108_v31  ;;  %5570 = vmatprep.mubr.msk.f32.mxu1 %vm5913_vm1, %v5912_v2 }
 0x1ca   :  { %5536 = vmatmul.mubr.f32.vlgmr.msra.gmra.mxu0 %v1672_v40  ;;  %5545 = vmatprep.subr.mxu0 %v6105_v30 }
 0x1cb   :  { %5546 = vmatpush3.msra.mxu0 %v6105_v30  ;;  %5549 = vmatprep.mubr.f32.mxu0 %v1661_v39 }
 0x1cc   :  { %5547 = vmatprep.subr.mxu0 %v6115_v33 }
 0x1cd   :  { %5548 = vmatpush3.msra.mxu0 %v6115_v33 }
 0x1ce   :  { %5550 = vmatmul.mubr.f32.vlgmr.msra.gmra.mxu0 %v1671_v37  ;;  %5559 = vmatprep.subr.mxu0 %v5912_v2 }
 0x1cf   :  { %5563 = vmatprep.mubr.msk.f32.mxu0 %vm5913_vm1, %v5912_v2 }
 0x27e   :  { %v5530_v26 = vpop.f32.mrf.mxu1 }
 0x280   :  { %v1758_v28 = vpop.f32.mrf.mxu1 }
 0x282   :  { %v5544_v31 = vpop.f32.mrf.mxu1 }
 0x284   :  { %v1922_v54 = vpop.f32.mrf.mxu1 }
 0x286   :  { %v5523_v50 = vpop.f32.mrf.mxu0  ;;  %v5558_v60 = vpop.f32.mrf.mxu1 }
 0x287   :  { %v1678_v30 = vadd.f32 %v5523_v50, %v5181_v29 }
 0x288   :  { %v1667_v51 = vpop.f32.mrf.mxu0  ;;  %v2086_v4 = vpop.f32.mrf.mxu1 }
 0x289   :  { %v1668_v52 = vadd.f32 %v5181_v29, %v1667_v51  ;;  %v1765_v53 = vadd.f32 %v5530_v26, %v1678_v30 }
 0x28a   :  { %v5537_v33 = vpop.f32.mrf.mxu0 }
 0x28b   :  { %v1848_v55 = vadd.f32 %v5537_v33, %v1765_v53  ;;  %v1759_v56 = vadd.f32 %v1758_v28, %v1668_v52 }
 0x28c   :  { %v1840_v57 = vpop.f32.mrf.mxu0 }
 0x28d   :  { %v1841_v58 = vadd.f32 %v1840_v57, %v1759_v56  ;;  %v1931_v59 = vadd.f32 %v5544_v31, %v1848_v55 }
 0x28e   :  { %v5551_v61 = vpop.f32.mrf.mxu0 }
 0x28f   :  { %v2014_v62 = vadd.f32 %v5551_v61, %v1931_v59  ;;  %v1923_v63 = vadd.f32 %v1922_v54, %v1841_v58 }
 0x290   :  { %v2007_v0 = vpop.f32.mrf.mxu0 }
 0x291   :  { %v6149_v1 = vadd.f32 %v5558_v60, %v2014_v62  ;;  %v2008_v3 = vadd.f32 %v2007_v0, %v1923_v63 }
 0x293   :  { %v6151_v5 = vadd.f32 %v2086_v4, %v2008_v3  ;;  %v2097_v6 = vmul.f32 %v6149_v1, %v6149_v1 }
 0x295   :  { %2102 = vrot.lane.b32.xlu1 %v2097_v6, %s5915_s10  ;;  %v2096_v7 = vmul.f32 %v6151_v5, %v6151_v5 }
 0x299   :  { %2100 = vrot.lane.b32.xlu1 %v2096_v7, %s5915_s10 }
 0x2c2   :  { %2599 = vxpose.xlu1.b32.start.end [1/1] (short) (narrow) %v6164_v11, 16 }
 0x307   :  { %v2103_v47 = vpop.permute.xlu1 %2102 }
 0x308   :  { %v2107_v15 = vsel %vm1583_vm10, %v6149_v1, %v2103_v47 }
 0x309   :  { %v2110_v16 = vsel %vm2108_vm14, %v2107_v15, 1.0 }
 0x30a   :  { %v2144_v18 = vand.u32 4294901760, %v2110_v16 }
 0x30b   :  { %v2101_v19 = vpop.permute.xlu1 %2100 }
 0x30c   :  { %v2222_v20 = vsub.f32 %v2110_v16, %v2144_v18  ;;  %v2106_v21 = vsel %vm1583_vm10, %v6151_v5, %v2101_v19  ;;  %5560 = vmatpush3.msra.mxu0 %v2144_v18 }
 0x30d   :  { %v2109_v22 = vsel %vm2108_vm14, %v2106_v21, 1.0  ;;  %5561 = vmatprep.subr.mxu0 %v5912_v2 }
 0x30e   :  { %v2223_v24 = vand.u32 4294901760, %v2222_v20  ;;  %v2147_v25 = vand.u32 4294901760, %v2109_v22 }
 0x310   :  { %v2229_v27 = vsub.f32 %v2109_v22, %v2147_v25  ;;  %5562 = vmatpush3.msra.mxu0 %v2147_v25  ;;  %v2224_v32 = vsub.f32 %v2222_v20, %v2223_v24 }
 0x311   :  { %5573 = vmatprep.subr.mxu0 %v5912_v2  ;;  %5564 = vmatmul.mubr.f32.vlgmr.msra.gmra.mxu0 %v6181_v23 }
 0x312   :  { %v2230_v34 = vand.u32 4294901760, %v2229_v27  ;;  %5574 = vmatpush3.msra.mxu0 %v2222_v20  ;;  %v2225_v35 = vand.u32 4294901760, %v2224_v32  ;;  %5577 = vmatprep.mubr.msk.f32.mxu0 %vm5913_vm1, %v5912_v2 }
 0x313   :  { %5575 = vmatprep.subr.mxu0 %v5912_v2 }
 0x314   :  { %5567 = vmatpush3.msra.mxu1 %v2225_v35  ;;  %5576 = vmatpush3.msra.mxu0 %v2229_v27  ;;  %v2231_v36 = vsub.f32 %v2229_v27, %v2230_v34 }
 0x315   :  { %5587 = vmatprep.subr.mxu0 %v5912_v2  ;;  %5578 = vmatmul.mubr.f32.vlgmr.msra.gmra.mxu0 %v6169_v13 }
 0x316   :  { %5588 = vmatpush3.msra.mxu0 %v2223_v24  ;;  %5568 = vmatprep.subr.mxu1 %v5912_v2  ;;  %v2232_v37 = vand.u32 4294901760, %v2231_v36 }
 0x317   :  { %5589 = vmatprep.subr.mxu0 %v5912_v2  ;;  %5591 = vmatprep.mubr.msk.f32.mxu0 %vm5913_vm1, %v5912_v2 }
 0x318   :  { %5569 = vmatpush3.msra.mxu1 %v2232_v37  ;;  %5590 = vmatpush3.msra.mxu0 %v2230_v34 }
 0x319   :  { %5571 = vmatmul.mubr.msk.f32.vlgmr.msra.gmra.mxu1 %vm2111_vm13, %v6164_v11  ;;  %5580 = vmatprep.subr.mxu1 %v5912_v2 }
 0x31a   :  { %5581 = vmatpush3.msra.mxu1 %v2144_v18  ;;  %5584 = vmatprep.mubr.msk.f32.mxu1 %vm5913_vm1, %v5912_v2 }
 0x31b   :  { %5582 = vmatprep.subr.mxu1 %v5912_v2  ;;  %5592 = vmatmul.mubr.msk.f32.vlgmr.msra.gmra.mxu0 %vm2111_vm13, %v6164_v11 }
 0x31c   :  { %5583 = vmatpush3.msra.mxu1 %v2147_v25 }
 0x31d   :  { %5585 = vmatmul.mubr.f32.vlgmr.msra.gmra.mxu1 %v6172_v14  ;;  %5594 = vmatprep.subr.mxu1 %v5912_v2 }
 0x31e   :  { %5595 = vmatpush3.msra.mxu1 %v2144_v18  ;;  %5598 = vmatprep.mubr.msk.f32.mxu1 %vm5913_vm1, %v5912_v2 }
 0x31f   :  { %5596 = vmatprep.subr.mxu1 %v5912_v2 }
 0x320   :  { %5597 = vmatpush3.msra.mxu1 %v2147_v25 }
 0x321   :  { %5599 = vmatmul.mubr.msk.f32.vlgmr.msra.gmra.mxu1 %vm2111_vm13, %v6164_v11 }
 0x33e   :  { %v2615_v39 = vpop.trf.xlu1 }
 0x33f   :  { %v2633_v40 = vsel %vm2631_vm15, %v2615_v39, 0 }
 0x340   :  { %v6211_v41 = vand.u32 4294901760, %v2633_v40 }
 0x342   :  { %5608 = vmatprep.mubr.f32.mxu1 %v6211_v41  ;;  %v2705_v56 = vsub.f32 %v2633_v40, %v6211_v41  ;;  %v2616_v61 = vpop.trf.xlu1 }
 0x343   :  { %v2636_v62 = vsel %vm2631_vm15, %v2616_v61, 0 }
 0x344   :  { %v2706_v57 = vand.u32 4294901760, %v2705_v56  ;;  %v2714_v63 = vand.u32 4294901760, %v2636_v62 }
 0x346   :  { %v2707_v58 = vsub.f32 %v2705_v56, %v2706_v57  ;;  %v2715_v0 = vsub.f32 %v2636_v62, %v2714_v63 }
 0x348   :  { %v2708_v60 = vand.u32 4294901760, %v2707_v58  ;;  %v2716_v3 = vand.u32 4294901760, %v2715_v0 }
 0x34a   :  { %5603 = vmatprep.mubr.f32.mxu0 %v2708_v60  ;;  %v2717_v4 = vsub.f32 %v2715_v0, %v2716_v3 }
 0x34c   :  { %v2718_v8 = vand.u32 4294901760, %v2717_v4 }
 0x3d1   :  { %v2188_v42 = vpop.f32.mrf.mxu0 }
 0x3d3   :  { %v5565_v43 = vpop.f32.mrf.mxu0 }
 0x3d5   :  { %v2345_v44 = vpop.f32.mrf.mxu0 }
 0x3d7   :  { %v5579_v45 = vpop.f32.mrf.mxu0 }
 0x3d9   :  { %v2269_v46 = vpop.f32.mrf.mxu1 }
 0x3da   :  { %v2270_v49 = vadd.f32 %v2269_v46, %v2188_v42 }
 0x3db   :  { %v5572_v26 = vpop.f32.mrf.mxu1  ;;  %v2497_v28 = vpop.f32.mrf.mxu0 }
 0x3dc   :  { %v2346_v29 = vadd.f32 %v2345_v44, %v2270_v49 }
 0x3dd   :  { %v2420_v31 = vpop.f32.mrf.mxu1  ;;  %v5593_v50 = vpop.f32.mrf.mxu0 }
 0x3de   :  { %v2421_v30 = vadd.f32 %v2420_v31, %v2346_v29 }
 0x3df   :  { %v5586_v51 = vpop.f32.mrf.mxu1 }
 0x3e0   :  { %v2498_v52 = vadd.f32 %v2497_v28, %v2421_v30  ;;  %v77_v51 = vld [vmem:[%s6605_s2] sm:$0xff]  ;;  %s5917_s2 = smov 116  }
 0x3e1   :  { %v2570_v53 = vpop.f32.mrf.mxu1 }
 0x3e2   :  { %v6214_v54 = vadd.f32 %v2570_v53, %v2498_v52  ;;  %v3614_v52 = vld [vmem:[%s6609_s6] sm:$0x3]  ;;  %s5918_s6 = smov 114  }
 0x3e3   :  { %v5600_v33 = vpop.f32.mrf.mxu1 }
 0x3e4   :  { %v2574_v55 = vmax.f32 %v6214_v54, 1.0 }
 0x3e6   :  { %5886 = vrcp.f32 %v2574_v55  ;;  %v3619_v55 = vsel %vm91_vm0, %v3614_v52, 0 }
 0x3f3   :  { %v5887_v59 = vpop.eup %5886 }
 0x3f4   :  { %2579 = vperm.xlu0 %5883, %v5887_v59  }
 0x3f8   :  { %5884 = vset.pattern.permute.xlu0 %v5914_v9 }
 0x46f   :  { %v6220_v6 = vpop.permute.xlu0 %2579 }
 0x470   :  { %v6224_v7 = vmul.f32 %v6220_v6, %v6214_v54 }
 0x472   :  { %v2669_v10 = vand.u32 4294901760, %v6224_v7 }
 0x474   :  { %5601 = vmatprep.subr.mxu0 %v2669_v10  ;;  %v2756_v12 = vsub.f32 %v6224_v7, %v2669_v10 }
 0x475   :  { %5602 = vmatpush3.msra.mxu0 %v2669_v10 }
 0x476   :  { %5604 = vmatmul.mubr.f32.vlgmr.msra.gmra.mxu0 %v2718_v8  ;;  %5611 = vmatprep.subr.mxu0 %v2756_v12  ;;  %v2757_v9 = vand.u32 4294901760, %v2756_v12 }
 0x477   :  { %5612 = vmatpush3.msra.mxu0 %v2756_v12  ;;  %5613 = vmatprep.mubr.f32.mxu0 %v2705_v56 }
 0x478   :  { %5621 = vmatprep.subr.mxu0 %v2757_v9  ;;  %v2758_v47 = vsub.f32 %v2756_v12, %v2757_v9 }
 0x47a   :  { %5614 = vmatmul.mubr.f32.vlgmr.msra.gmra.mxu0 %v2715_v0  ;;  %v2759_v15 = vand.u32 4294901760, %v2758_v47 }
 0x47b   :  { %5622 = vmatpush3.msra.mxu0 %v2757_v9  ;;  %5623 = vmatprep.mubr.f32.mxu0 %v6211_v41 }
 0x47c   :  { %5606 = vmatprep.subr.mxu1 %v2759_v15  ;;  %5631 = vmatprep.subr.mxu0 %v5912_v2 }
 0x47d   :  { %5607 = vmatpush3.msra.mxu1 %v2759_v15 }
 0x47e   :  { %5609 = vmatmul.mubr.f32.vlgmr.msra.gmra.mxu1 %v2714_v63  ;;  %5616 = vmatprep.subr.mxu1 %v2669_v10 }
 0x47f   :  { %5624 = vmatmul.mubr.f32.vlgmr.msra.gmra.mxu0 %v2714_v63  ;;  %5617 = vmatpush3.msra.mxu1 %v2669_v10 }
 0x480   :  { %5618 = vmatprep.mubr.f32.mxu1 %v2706_v57  ;;  %5626 = vmatprep.subr.mxu1 %v2669_v10 }
 0x481   :  { %5635 = vmatprep.mubr.msk.f32.mxu0 %vm5913_vm1, %v5912_v2 }
 0x482   :  { %5619 = vmatmul.mubr.f32.vlgmr.msra.gmra.mxu1 %v2716_v3 }
 0x483   :  { %5627 = vmatpush3.msra.mxu1 %v2669_v10  ;;  %5628 = vmatprep.mubr.f32.mxu1 %v6211_v41 }
 0x484   :  { %5638 = vmatprep.subr.mxu1 %v5912_v2 }
 0x486   :  { %5629 = vmatmul.mubr.f32.vlgmr.msra.gmra.mxu1 %v2714_v63 }
 0x487   :  { %5642 = vmatprep.mubr.msk.f32.mxu1 %vm5913_vm1, %v5912_v2 }
 0x536   :  { %v5605_v16 = vpop.f32.mrf.mxu0 }
 0x538   :  { %v2710_v17 = vpop.f32.mrf.mxu0 }
 0x53a   :  { %v5615_v18 = vpop.f32.mrf.mxu0 }
 0x53c   :  { %v2876_v19 = vpop.f32.mrf.mxu0 }
 0x53e   :  { %v5610_v20 = vpop.f32.mrf.mxu1 }
 0x53f   :  { %v2803_v21 = vadd.f32 %v5610_v20, %v5605_v16  ;;  %v5625_v27 = vpop.f32.mrf.mxu0 }
 0x540   :  { %v2796_v22 = vpop.f32.mrf.mxu1 }
 0x541   :  { %v2797_v24 = vadd.f32 %v2796_v22, %v2710_v17  ;;  %v2884_v25 = vadd.f32 %v5615_v18, %v2803_v21  ;;  %v3039_v40 = vpop.f32.mrf.mxu0 }
 0x542   :  { %v5620_v32 = vpop.f32.mrf.mxu1 }
 0x543   :  { %v2966_v34 = vadd.f32 %v5620_v32, %v2884_v25  ;;  %v2877_v35 = vadd.f32 %v2876_v19, %v2797_v24 }
 0x544   :  { %v2957_v36 = vpop.f32.mrf.mxu1 }
 0x545   :  { %v2958_v37 = vadd.f32 %v2957_v36, %v2877_v35  ;;  %v3046_v39 = vadd.f32 %v5625_v27, %v2966_v34  ;;  %v4111_v34 = vld [vmem:[%s6614_s11 + $0x40] sm:$0x1f]  ;;  %v4110_v35 = vld [vmem:[%s6614_s11 + $0x38] sm:$0xff] }
 0x546   :  { %v5630_v41 = vpop.f32.mrf.mxu1  ;;  %v6328_v36 = vand.u32 4294901760, %v4110_v35 }
 0x547   :  { %v3124_v42 = vadd.f32 %v5630_v41, %v3046_v39  ;;  %v3040_v43 = vadd.f32 %v3039_v40, %v2958_v37 }
 0x548   :  { %v3117_v44 = vpop.f32.mrf.mxu1 }
 0x549   :  { %v3128_v45 = vsub.f32 %v6149_v1, %v3124_v42  ;;  %v3118_v46 = vadd.f32 %v3117_v44, %v3040_v43  ;;  %v2583_v1 = vmul.f32 %v6224_v7, %v6224_v7 }
 0x54b   :  { %v3130_v49 = vmul.f32 %v3128_v45, %v3128_v45  ;;  %v3127_v26 = vsub.f32 %v6151_v5, %v3118_v46 }
 0x54d   :  { %v3132_v28 = vmul.f32 %v3130_v49, %v3128_v45  ;;  %v3129_v29 = vmul.f32 %v3127_v26, %v3127_v26  ;;  %v3134_v31 = vmul.f32 %v3130_v49, %v3130_v49  ;;  %v4109_v49 = vld [vmem:[%s6614_s11 + $0x30] sm:$0xff] }
 0x54f   :  { %v3131_v50 = vmul.f32 %v3129_v29, %v3127_v26  ;;  %3139 = vrot.lane.b32.xlu0 %v3134_v31, %s5915_s10  ;;  %v3133_v30 = vmul.f32 %v3129_v29, %v3129_v29  ;;  %v6355_v26 = vand.u32 4294901760, %v4109_v49  ;;  %v4108_v29 = vld [vmem:[%s6614_s11 + $0x28] sm:$0xff] }
 0x551   :  { %v6361_v31 = vsub.f32 %v4109_v49, %v6355_v26 }
 0x553   :  { %3137 = vrot.lane.b32.xlu0 %v3133_v30, %s5915_s10 }
 0x557   :  { %79 = vperm.xlu0 %5884, %v77_v51   ;;  %v4107_v51 = vld [vmem:[%s6614_s11 + $0x20] sm:$0xff] }
 0x558   :  { %v6374_v52 = vand.u32 4294901760, %v4107_v51 }
 0x55b   :  { %2585 = vrot.lane.b32.xlu0 %v2583_v1, %s5915_s10  ;;  %v4242_v1 = vand.u32 4294901760, %v6361_v31 }
 0x55c   :  { %5885 = vset.pattern.permute.xlu0 %v5916_v38  ;;  %v6254_v38 = vand.u32 4294901760, %v3619_v55 }
 0x55e   :  { %v3729_v3 = vsub.f32 %v3619_v55, %v6254_v38  ;;  %v4243_v55 = vsub.f32 %v6361_v31, %v4242_v1 }
 0x560   :  { %v3730_v8 = vand.u32 4294901760, %v3729_v3 }
 0x5c1   :  { %v3140_v5 = vpop.permute.xlu0 %3139 }
 0x5c2   :  { %v3144_v53 = vsel %vm1583_vm10, %v3132_v28, %v3140_v5 }
 0x5c3   :  { %v3174_v33 = vand.u32 4294901760, %v3144_v53 }
 0x5c5   :  { %v3252_v56 = vsub.f32 %v3144_v53, %v3174_v33  ;;  %5632 = vmatpush3.msra.mxu0 %v3174_v33  ;;  %v3138_v57 = vpop.permute.xlu0 %3137 }
 0x5c6   :  { %v3143_v58 = vsel %vm1583_vm10, %v3131_v50, %v3138_v57  ;;  %5633 = vmatprep.subr.mxu0 %v5912_v2  ;;  %v6363_v50 = vand.u32 4294901760, %v4108_v29  ;;  %v6386_v57 = vsub.f32 %v4107_v51, %v6374_v52  ;;  %vm4099_vm10 = vcmask 384000  }
 0x5c7   :  { %v3253_v59 = vand.u32 4294901760, %v3252_v56  ;;  %v3177_v60 = vand.u32 4294901760, %v3143_v58 }
 0x5c8   :  { %v6372_v5 = vsub.f32 %v4108_v29, %v6363_v50 }
 0x5c9   :  { %v3254_v61 = vsub.f32 %v3252_v56, %v3253_v59  ;;  %v3259_v62 = vsub.f32 %v3143_v58, %v3177_v60  ;;  %5634 = vmatpush3.msra.mxu0 %v3177_v60 }
 0x5ca   :  { %5645 = vmatprep.subr.mxu0 %v5912_v2  ;;  %5636 = vmatmul.mubr.f32.vlgmr.msra.gmra.mxu0 %v6181_v23 }
 0x5cb   :  { %v3260_v63 = vand.u32 4294901760, %v3259_v62  ;;  %5646 = vmatpush3.msra.mxu0 %v3252_v56  ;;  %v3255_v0 = vand.u32 4294901760, %v3254_v61  ;;  %5649 = vmatprep.mubr.msk.f32.mxu0 %vm5913_vm1, %v5912_v2  ;;  %v4249_v56 = vand.u32 4294901760, %v6372_v5  ;;  %v4244_v61 = vand.u32 4294901760, %v4243_v55 }
 0x5cc   :  { %5647 = vmatprep.subr.mxu0 %v5912_v2 }
 0x5cd   :  { %v3261_v4 = vsub.f32 %v3259_v62, %v3260_v63  ;;  %5639 = vmatpush3.msra.mxu1 %v3255_v0  ;;  %5648 = vmatpush3.msra.mxu0 %v3259_v62  ;;  %v4250_v62 = vsub.f32 %v6372_v5, %v4249_v56 }
 0x5ce   :  { %5659 = vmatprep.subr.mxu0 %v5912_v2  ;;  %5650 = vmatmul.mubr.f32.vlgmr.msra.gmra.mxu0 %v6169_v13  ;;  %v3731_v13 = vsub.f32 %v3729_v3, %v3730_v8 }
 0x5cf   :  { %5660 = vmatpush3.msra.mxu0 %v3253_v59  ;;  %5640 = vmatprep.subr.mxu1 %v5912_v2  ;;  %v3262_v23 = vand.u32 4294901760, %v3261_v4 }
 0x5d0   :  { %5661 = vmatprep.subr.mxu0 %v5912_v2  ;;  %5663 = vmatprep.mubr.msk.f32.mxu0 %vm5913_vm1, %v5912_v2  ;;  %v3732_v16 = vand.u32 4294901760, %v3731_v13  ;;  %v4251_v13 = vand.u32 4294901760, %v4250_v62 }
 0x5d1   :  { %5641 = vmatpush3.msra.mxu1 %v3262_v23  ;;  %5662 = vmatpush3.msra.mxu0 %v3260_v63 }
 0x5d2   :  { %v80_v10 = vpop.permute.xlu0 %79  ;;  %5643 = vmatmul.mubr.msk.f32.vlgmr.msra.gmra.mxu1 %vm2111_vm13, %v6164_v11  ;;  %5652 = vmatprep.subr.mxu1 %v5912_v2 }
 0x5d3   :  { %vm81_vm3 = vcmp.eq.s32.totalorder %v6074_v48, %v80_v10  ;;  %5653 = vmatpush3.msra.mxu1 %v3174_v33  ;;  %5656 = vmatprep.mubr.msk.f32.mxu1 %vm5913_vm1, %v5912_v2 }
 0x5d4   :  { %v5173_v12 = vsel %vm81_vm3, 1.0, %v5912_v2  ;;  %5654 = vmatprep.subr.mxu1 %v5912_v2  ;;  %5664 = vmatmul.mubr.msk.f32.vlgmr.msra.gmra.mxu0 %vm2111_vm13, %v6164_v11 }
 0x5d5   :  { %v3616_v9 = vsel %vm87_vm2, %v5173_v12, 0  ;;  %5655 = vmatpush3.msra.mxu1 %v3177_v60  ;;  %5673 = vmatprep.subr.mxu0 %v5912_v2 }
 0x5d6   :  { %v3688_v47 = vsub.f32 %v3616_v9, %v3616_v9  ;;  %v2586_v15 = vpop.permute.xlu0 %2585  ;;  %5657 = vmatmul.mubr.f32.vlgmr.msra.gmra.mxu1 %v6172_v14  ;;  %5666 = vmatprep.subr.mxu1 %v5912_v2 }
 0x5d7   :  { %v2588_v48 = vsub.f32 %v6224_v7, %v2586_v15  ;;  %5667 = vmatpush3.msra.mxu1 %v3174_v33  ;;  %5670 = vmatprep.mubr.msk.f32.mxu1 %vm5913_vm1, %v5912_v2  ;;  %v4106_v33 = vld [vmem:[%s6614_s11 + $0x18] sm:$0xff] }
 0x5d8   :  { %5668 = vmatprep.subr.mxu1 %v5912_v2  ;;  %5674 = vmatpush3.msra.mxu0 %v6254_v38  ;;  %v3689_v17 = vand.u32 4294901760, %v3688_v47  ;;  %v6388_v58 = vand.u32 4294901760, %v4106_v33 }
 0x5d9   :  { %v2589_v18 = vmax.f32 %v2588_v48, 0.0  ;;  %5669 = vmatpush3.msra.mxu1 %v3177_v60  ;;  %5675 = vmatprep.mubr.msk.f32.mxu0 %vm5913_vm1, %v5912_v2  ;;  %v4105_v60 = vld [vmem:[%s6614_s11 + $0x10] sm:$0xff] }
 0x5da   :  { %5671 = vmatmul.mubr.msk.f32.vlgmr.msra.gmra.mxu1 %vm2111_vm13, %v6164_v11  ;;  %5678 = vmatprep.subr.mxu1 %v5912_v2  ;;  %v3690_v14 = vsub.f32 %v3688_v47, %v3689_v17  ;;  %v6401_v4 = vsub.f32 %v4106_v33, %v6388_v58  ;;  %v6403_v23 = vand.u32 4294901760, %v4105_v60 }
 0x5db   :  { %v2590_v19 = vadd.f32 1e-06, %v2589_v18  ;;  %5679 = vmatpush3.msra.mxu1 %v3732_v16  ;;  %5680 = vmatprep.mubr.msk.f32.mxu1 %vm5913_vm1, %v5912_v2 }
 0x5dc   :  { %v3691_v20 = vand.u32 4294901760, %v3690_v14  ;;  %5683 = vmatprep.subr.mxu0 %v5912_v2  ;;  %5688 = vmatprep.subr.mxu1 %v5912_v2  ;;  %v4263_v15 = vand.u32 4294901760, %v6401_v4  ;;  %v6415_v48 = vsub.f32 %v4105_v60, %v6403_v23 }
 0x5dd   :  { %5888 = vrsqrt.f32 %v2590_v19  ;;  %vm2593_vm5 = vcmp.eq.f32.partialorder %v2590_v19, inf  ;;  %v2596_v27 = vand.u32 2147483648, %v2590_v19 }
 0x5de   :  { %5676 = vmatmul.mubr.f32.vlgmr.msra.gmra.mxu0 %v3691_v20  ;;  %5681 = vmatmul.mubr.msk.f32.vlgmr.msra.gmra.mxu1 %vm87_vm2, %v5173_v12 }
 0x5df   :  { %5684 = vmatpush3.msra.mxu0 %v3729_v3  ;;  %5685 = vmatprep.mubr.msk.f32.mxu0 %vm5913_vm1, %v5912_v2  ;;  %v4256_v3 = vand.u32 4294901760, %v6386_v57 }
 0x5e0   :  { %5689 = vmatpush3.msra.mxu1 %v6254_v38  ;;  %5690 = vmatprep.mubr.msk.f32.mxu1 %vm5913_vm1, %v5912_v2 }
 0x5e1   :  { %5693 = vmatprep.subr.mxu0 %v5912_v2  ;;  %5698 = vmatprep.subr.mxu1 %v5912_v2 }
 0x5e2   :  { %5686 = vmatmul.mubr.f32.vlgmr.msra.gmra.mxu0 %v3688_v47  ;;  %5691 = vmatmul.mubr.f32.vlgmr.msra.gmra.mxu1 %v3689_v17  ;;  %v4257_v47 = vsub.f32 %v6386_v57, %v4256_v3  ;;  %v4103_v17 = vld [vmem:[%s6614_s11] sm:$0xff] }
 0x5e3   :  { %5694 = vmatpush3.msra.mxu0 %v3730_v8  ;;  %5695 = vmatprep.mubr.msk.f32.mxu0 %vm5913_vm1, %v5912_v2  ;;  %v4104_v8 = vld [vmem:[%s6614_s11 + $0x8] sm:$0xff]  ;;  %v6423_v14 = vand.u32 4294901760, %v4103_v17  ;;  %s5920_s11 = smov 35  }
 0x5e4   :  { %5699 = vmatpush3.msra.mxu1 %v6254_v38  ;;  %5700 = vmatprep.mubr.msk.f32.mxu1 %vm5913_vm1, %v5912_v2  ;;  %v6417_v16 = vand.u32 4294901760, %v4104_v8  ;;  %v4258_v20 = vand.u32 4294901760, %v4257_v47 }
 0x5e5   :  { %5724 = vmatprep.subr.mxu1 %v5912_v2  ;;  %5703 = vmatprep.subr.mxu0 %v5912_v2 }
 0x5e6   :  { %5696 = vmatmul.mubr.msk.f32.vlgmr.msra.gmra.mxu0 %vm87_vm2, %v5173_v12  ;;  %5701 = vmatmul.mubr.msk.f32.vlgmr.msra.gmra.mxu1 %vm87_vm2, %v5173_v12  ;;  %vm2595_vm2 = vcmp.eq.f32.partialorder %v2590_v19, 0.0 }
 0x5e7   :  { %5742 = vmatprep.mubr.msk.f32.mxu1 %vm5913_vm1, %v5912_v2  ;;  %5721 = vmatprep.mubr.msk.f32.mxu0 %vm5913_vm1, %v5912_v2 }
 0x5ea   :  { %v5889_v11 = vpop.eup %5888 }
 0x5eb   :  { %v6317_v21 = vmul.f32 %v5889_v11, %v5889_v11  ;;  %v2592_v24 = vmul.f32 %v5889_v11, %v2590_v19 }
 0x5ed   :  { %v3606_v22 = vmul.f32 %v5889_v11, %v6317_v21  ;;  %v2594_v25 = vsel %vm2593_vm5, %v2590_v19, %v2592_v24  ;;  %v4264_v11 = vsub.f32 %v6401_v4, %v4263_v15  ;;  %v6432_v24 = vsub.f32 %v4104_v8, %v6417_v16 }
 0x5ee   :  { %v2597_v32 = vsel %vm2595_vm2, %v2596_v27, %v2594_v25  ;;  %v6436_v27 = vsub.f32 %v4103_v17, %v6423_v14  ;;  %v3612_v29 = vmul.f32 %v6317_v21, %v6317_v21 }
 0x5ef   :  { %3608 = vrot.lane.b32.xlu0 %v3606_v22, %s5917_s2  ;;  %v4270_v22 = vand.u32 4294901760, %v6415_v48 }
 0x5f3   :  { %4069 = vrot.lane.b32.xlu0 %v6214_v54, %s5918_s6  ;;  %v4125_v54 = vsel %vm4123_vm6, %v4111_v34, 0  ;;  %v4265_v34 = vand.u32 4294901760, %v4264_v11  ;;  %v4067_v11 = vld [vmem:[%s6606_s3] sm:$0xff] }
 0x5f4   :  { %v6330_v37 = vand.u32 4294901760, %v4125_v54 }
 0x5f6   :  { %v6336_v39 = vsub.f32 %v4125_v54, %v6330_v37  ;;  %5704 = vmatpush3.msra.mxu0 %v6330_v37  ;;  %v4277_v54 = vand.u32 4294901760, %v6432_v24 }
 0x5f7   :  { %4073 = vrot.lane.b32.xlu0 %v6224_v7, %s5919_s4  ;;  %v6333_v7 = vsub.f32 %v4110_v35, %v6328_v36  ;;  %5705 = vmatprep.subr.mxu0 %v5912_v2  ;;  %v4271_v35 = vsub.f32 %v6415_v48, %v4270_v22 }
 0x5f8   :  { %v4228_v41 = vand.u32 4294901760, %v6336_v39  ;;  %5706 = vmatpush3.msra.mxu0 %v6328_v36 }
 0x5f9   :  { %v4235_v40 = vand.u32 4294901760, %v6333_v7  ;;  %5707 = vmatprep.subr.mxu0 %v5912_v2 }
 0x5fa   :  { %v4229_v43 = vsub.f32 %v6336_v39, %v4228_v41  ;;  %5708 = vmatpush3.msra.mxu0 %v6355_v26 }
 0x5fb   :  { %4077 = vrot.lane.b32.xlu0 %v2597_v32, %s5919_s4  ;;  %v4236_v42 = vsub.f32 %v6333_v7, %v4235_v40  ;;  %5709 = vmatprep.subr.mxu0 %v5912_v2 }
 0x5fc   :  { %v4230_v44 = vand.u32 4294901760, %v4229_v43  ;;  %5710 = vmatpush3.msra.mxu0 %v6363_v50  ;;  %v4284_v43 = vand.u32 4294901760, %v6436_v27 }
 0x5fd   :  { %v4237_v45 = vand.u32 4294901760, %v4236_v42  ;;  %5711 = vmatprep.subr.mxu0 %v5912_v2 }
 0x5fe   :  { %5725 = vmatpush3.msra.mxu1 %v4230_v44  ;;  %5712 = vmatpush3.msra.mxu0 %v6374_v52 }
 0x5ff   :  { %5726 = vmatprep.subr.mxu1 %v5912_v2  ;;  %5713 = vmatprep.subr.mxu0 %v5912_v2 }
 0x600   :  { %5727 = vmatpush3.msra.mxu1 %v4237_v45  ;;  %5714 = vmatpush3.msra.mxu0 %v6388_v58  ;;  %v4272_v45 = vand.u32 4294901760, %v4271_v35 }
 0x601   :  { %5728 = vmatprep.subr.mxu1 %v5912_v2  ;;  %5715 = vmatprep.subr.mxu0 %v5912_v2 }
 0x602   :  { %5729 = vmatpush3.msra.mxu1 %v4244_v61  ;;  %5716 = vmatpush3.msra.mxu0 %v6403_v23 }
 0x603   :  { %5730 = vmatprep.subr.mxu1 %v5912_v2  ;;  %5717 = vmatprep.subr.mxu0 %v5912_v2 }
 0x604   :  { %5731 = vmatpush3.msra.mxu1 %v4251_v13  ;;  %5718 = vmatpush3.msra.mxu0 %v6417_v16 }
 0x605   :  { %5732 = vmatprep.subr.mxu1 %v5912_v2  ;;  %5719 = vmatprep.subr.mxu0 %v5912_v2 }
 0x606   :  { %5733 = vmatpush3.msra.mxu1 %v4258_v20  ;;  %5720 = vmatpush3.msra.mxu0 %v6423_v14 }
 0x607   :  { %5734 = vmatprep.subr.mxu1 %v5912_v2  ;;  %5745 = vmatprep.subr.mxu0 %v5912_v2 }
 0x608   :  { %5735 = vmatpush3.msra.mxu1 %v4265_v34 }
 0x609   :  { %5736 = vmatprep.subr.mxu1 %v5912_v2 }
 0x60a   :  { %5737 = vmatpush3.msra.mxu1 %v4272_v45 }
 0x60b   :  { %5738 = vmatprep.subr.mxu1 %v5912_v2 }
 0x661   :  { %v3609_v49 = vpop.permute.xlu0 %3608 }
 0x68a   :  { %v3218_v46 = vpop.f32.mrf.mxu0 }
 0x68c   :  { %v5637_v28 = vpop.f32.mrf.mxu0 }
 0x68e   :  { %v3375_v30 = vpop.f32.mrf.mxu0 }
 0x690   :  { %v5651_v53 = vpop.f32.mrf.mxu0 }
 0x692   :  { %v3299_v59 = vpop.f32.mrf.mxu1 }
 0x693   :  { %v3300_v38 = vadd.f32 %v3299_v59, %v3218_v46  ;;  %v4278_v46 = vsub.f32 %v6432_v24, %v4277_v54 }
 0x694   :  { %v5644_v63 = vpop.f32.mrf.mxu1  ;;  %v3527_v0 = vpop.f32.mrf.mxu0 }
 0x695   :  { %v3376_v10 = vadd.f32 %v3375_v30, %v3300_v38  ;;  %v4285_v30 = vsub.f32 %v6436_v27, %v4284_v43  ;;  %v4279_v33 = vand.u32 4294901760, %v4278_v46 }
 0x696   :  { %v3450_v12 = vpop.f32.mrf.mxu1  ;;  %v5665_v9 = vpop.f32.mrf.mxu0 }
 0x697   :  { %v3451_v18 = vadd.f32 %v3450_v12, %v3376_v10  ;;  %v4286_v60 = vand.u32 4294901760, %v4285_v30  ;;  %5739 = vmatpush3.msra.mxu1 %v4279_v33 }
 0x698   :  { %v5658_v19 = vpop.f32.mrf.mxu1  ;;  %5740 = vmatprep.subr.mxu1 %v5912_v2 }
 0x699   :  { %v3528_v25 = vadd.f32 %v3527_v0, %v3451_v18  ;;  %5741 = vmatpush3.msra.mxu1 %v4286_v60  ;;  %v4070_v19 = vpop.permute.xlu0 %4069 }
 0x69a   :  { %v3600_v32 = vpop.f32.mrf.mxu1  ;;  %5766 = vmatprep.subr.mxu1 %v5912_v2 }
 0x69b   :  { %v3601_v42 = vadd.f32 %v3600_v32, %v3528_v25  ;;  %v4092_v32 = vsel %vm549_vm4, %v4067_v11, %v4070_v19  ;;  %v5192_v19 = vld [vmem:[%s6617_s14] ss:$0 sm:$0xff] }
 0x69c   :  { %v5672_v44 = vpop.f32.mrf.mxu1 }
 0x69d   :  { %v3605_v28 = vmul.f32 %v3601_v42, %v6220_v6  ;;  %v4074_v20 = vpop.permute.xlu0 %4073 }
 0x69e   :  { %v3693_v51 = vpop.f32.mrf.mxu0  ;;  %v3769_v53 = vpop.f32.mrf.mxu1  ;;  %v4094_v35 = vsel %vm4093_vm7, %v4092_v32, %v4074_v20 }
 0x69f   :  { %v3613_v55 = vmul.f32 %v3612_v29, %v3605_v28  ;;  %v3611_v59 = vmul.f32 %v3609_v49, %v3605_v28  ;;  %v3770_v61 = vadd.f32 %v3769_v53, %v3693_v51 }
 0x6a0   :  { %v5677_v38 = vpop.f32.mrf.mxu0  ;;  %v5682_v6 = vpop.f32.mrf.mxu1 }
 0x6a1   :  { %4085 = vrot.lane.b32.xlu0 %v3613_v55, %s5920_s11  ;;  %4081 = vrot.lane.b32.xlu1 %v3611_v59, %s5920_s11  ;;  %v4078_v25 = vpop.permute.xlu0 %4077 }
 0x6a2   :  { %v3843_v21 = vpop.f32.mrf.mxu0  ;;  %v3917_v62 = vpop.f32.mrf.mxu1  ;;  %v4096_v42 = vsel %vm4095_vm8, %v4094_v35, %v4078_v25 }
 0x6a3   :  { %v3844_v63 = vadd.f32 %v3843_v21, %v3770_v61 }
 0x6a4   :  { %v5687_v0 = vpop.f32.mrf.mxu0  ;;  %v5692_v8 = vpop.f32.mrf.mxu1 }
 0x6a5   :  { %v3918_v10 = vadd.f32 %v3917_v62, %v3844_v63 }
 0x6a6   :  { %v3991_v13 = vpop.f32.mrf.mxu0  ;;  %v4063_v12 = vpop.f32.mrf.mxu1 }
 0x6a7   :  { %v3992_v9 = vadd.f32 %v3991_v13, %v3918_v10 }
 0x6a8   :  { %v5697_v47 = vpop.f32.mrf.mxu0  ;;  %v5702_v17 = vpop.f32.mrf.mxu1 }
 0x6a9   :  { %v4064_v18 = vadd.f32 %v4063_v12, %v3992_v9 }
 0x6ab   :  { %4089 = vrot.lane.b32.xlu0 %v4064_v18, %s5921_s0 }
 0x713   :  { %v4082_v34 = vpop.permute.xlu1 %4081  ;;  %v4086_v44 = vpop.permute.xlu0 %4085 }
 0x714   :  { %v4098_v45 = vsel %vm4097_vm9, %v4096_v42, %v4082_v34 }
 0x715   :  { %v4100_v46 = vsel %vm4099_vm10, %v4098_v45, %v4086_v44 }
 0x71d   :  { %v4090_v49 = vpop.permute.xlu0 %4089 }
 0x71e   :  { %v4102_v28 = vsel %vm4101_vm11, %v4100_v46, %v4090_v49 }
 0x71f   :  { %v4121_v29 = vsel %vm4119_vm12, %v4102_v28, 0 }
 0x720   :  { %v6464_v30 = vand.u32 4294901760, %v4121_v29 }
 0x722   :  { %v4202_v51 = vsub.f32 %v4121_v29, %v6464_v30  ;;  %5743 = vmatmul.mubr.f32.vlgmr.msra.gmra.mxu1 %v6464_v30 }
 0x723   :  { %5767 = vmatpush3.msra.mxu1 %v6330_v37  ;;  %5784 = vmatprep.mubr.msk.f32.mxu1 %vm5913_vm1, %v5912_v2 }
 0x724   :  { %v4203_v53 = vand.u32 4294901760, %v4202_v51  ;;  %5768 = vmatprep.subr.mxu1 %v5912_v2 }
 0x725   :  { %5769 = vmatpush3.msra.mxu1 %v6328_v36 }
 0x726   :  { %5770 = vmatprep.subr.mxu1 %v5912_v2  ;;  %v4204_v33 = vsub.f32 %v4202_v51, %v4203_v53 }
 0x727   :  { %5771 = vmatpush3.msra.mxu1 %v6355_v26 }
 0x728   :  { %5772 = vmatprep.subr.mxu1 %v5912_v2  ;;  %v4205_v55 = vand.u32 4294901760, %v4204_v33 }
 0x729   :  { %5773 = vmatpush3.msra.mxu1 %v6363_v50 }
 0x72a   :  { %5774 = vmatprep.subr.mxu1 %v5912_v2  ;;  %5722 = vmatmul.mubr.f32.vlgmr.msra.gmra.mxu0 %v4205_v55 }
 0x72b   :  { %5746 = vmatpush3.msra.mxu0 %v6336_v39  ;;  %5775 = vmatpush3.msra.mxu1 %v6374_v52  ;;  %v4680_v39 = vld [vmem:[%s6616_s13] sm:$0xff] }
 0x72c   :  { %5747 = vmatprep.subr.mxu0 %v5912_v2  ;;  %5776 = vmatprep.subr.mxu1 %v5912_v2 }
 0x72d   :  { %5748 = vmatpush3.msra.mxu0 %v6333_v7  ;;  %5777 = vmatpush3.msra.mxu1 %v6388_v58 }
 0x72e   :  { %5749 = vmatprep.subr.mxu0 %v5912_v2  ;;  %5778 = vmatprep.subr.mxu1 %v5912_v2 }
 0x72f   :  { %5750 = vmatpush3.msra.mxu0 %v6361_v31  ;;  %5779 = vmatpush3.msra.mxu1 %v6403_v23 }
 0x730   :  { %5751 = vmatprep.subr.mxu0 %v5912_v2  ;;  %5780 = vmatprep.subr.mxu1 %v5912_v2 }
 0x731   :  { %5752 = vmatpush3.msra.mxu0 %v6372_v5  ;;  %5781 = vmatpush3.msra.mxu1 %v6417_v16 }
 0x732   :  { %5753 = vmatprep.subr.mxu0 %v5912_v2  ;;  %5782 = vmatprep.subr.mxu1 %v5912_v2 }
 0x733   :  { %5754 = vmatpush3.msra.mxu0 %v6386_v57  ;;  %5783 = vmatpush3.msra.mxu1 %v6423_v14 }
 0x734   :  { %5755 = vmatprep.subr.mxu0 %v5912_v2  ;;  %5785 = vmatmul.mubr.f32.vlgmr.msra.gmra.mxu1 %v4203_v53 }
 0x735   :  { %5808 = vmatprep.subr.mxu1 %v5912_v2  ;;  %5756 = vmatpush3.msra.mxu0 %v6401_v4 }
 0x736   :  { %5809 = vmatpush3.msra.mxu1 %v6330_v37  ;;  %5757 = vmatprep.subr.mxu0 %v5912_v2 }
 0x737   :  { %5810 = vmatprep.subr.mxu1 %v5912_v2  ;;  %5758 = vmatpush3.msra.mxu0 %v6415_v48 }
 0x738   :  { %5811 = vmatpush3.msra.mxu1 %v6328_v36  ;;  %5759 = vmatprep.subr.mxu0 %v5912_v2  ;;  %v4681_v36 = vld [vmem:[%s6616_s13 + $0x8] sm:$0x3] }
 0x739   :  { %5812 = vmatprep.subr.mxu1 %v5912_v2  ;;  %5760 = vmatpush3.msra.mxu0 %v6432_v24  ;;  %v4693_v37 = vsel %vm91_vm0, %v4681_v36, 0 }
 0x73a   :  { %5813 = vmatpush3.msra.mxu1 %v6355_v26  ;;  %5761 = vmatprep.subr.mxu0 %v5912_v2  ;;  %v4724_v7 = vand.u32 4294901760, %v4693_v37 }
 0x73b   :  { %5814 = vmatprep.subr.mxu1 %v5912_v2  ;;  %5762 = vmatpush3.msra.mxu0 %v6436_v27 }
 0x73c   :  { %5763 = vmatprep.mubr.msk.f32.mxu0 %vm5913_vm1, %v5912_v2  ;;  %5815 = vmatpush3.msra.mxu1 %v6363_v50 }
 0x73d   :  { %5764 = vmatmul.mubr.f32.vlgmr.msra.gmra.mxu0 %v4202_v51  ;;  %5787 = vmatprep.subr.mxu0 %v5912_v2 }
 0x73e   :  { %5816 = vmatprep.subr.mxu1 %v5912_v2  ;;  %5788 = vmatpush3.msra.mxu0 %v4228_v41  ;;  %v4727_v41 = vand.u32 4294901760, %v4680_v39 }
 0x73f   :  { %5817 = vmatpush3.msra.mxu1 %v6374_v52  ;;  %5789 = vmatprep.subr.mxu0 %v5912_v2 }
 0x740   :  { %5818 = vmatprep.subr.mxu1 %v5912_v2  ;;  %5790 = vmatpush3.msra.mxu0 %v4235_v40  ;;  %v6570_v40 = vsub.f32 %v4693_v37, %v4724_v7  ;;  %v4809_v31 = vsub.f32 %v4680_v39, %v4727_v41 }
 0x741   :  { %5819 = vmatpush3.msra.mxu1 %v6388_v58  ;;  %5791 = vmatprep.subr.mxu0 %v5912_v2 }
 0x742   :  { %5820 = vmatprep.subr.mxu1 %v5912_v2  ;;  %5792 = vmatpush3.msra.mxu0 %v4242_v1  ;;  %v4803_v26 = vand.u32 4294901760, %v6570_v40  ;;  %v4810_v1 = vand.u32 4294901760, %v4809_v31 }
 0x743   :  { %5821 = vmatpush3.msra.mxu1 %v6403_v23  ;;  %5793 = vmatprep.subr.mxu0 %v5912_v2 }
 0x744   :  { %5822 = vmatprep.subr.mxu1 %v5912_v2  ;;  %5794 = vmatpush3.msra.mxu0 %v4249_v56  ;;  %v4804_v50 = vsub.f32 %v6570_v40, %v4803_v26  ;;  %v4811_v52 = vsub.f32 %v4809_v31, %v4810_v1 }
 0x745   :  { %5823 = vmatpush3.msra.mxu1 %v6417_v16  ;;  %5795 = vmatprep.subr.mxu0 %v5912_v2 }
 0x746   :  { %5824 = vmatprep.subr.mxu1 %v5912_v2  ;;  %5796 = vmatpush3.msra.mxu0 %v4256_v3  ;;  %v4805_v5 = vand.u32 4294901760, %v4804_v50  ;;  %v4812_v56 = vand.u32 4294901760, %v4811_v52 }
 0x747   :  { %5825 = vmatpush3.msra.mxu1 %v6423_v14  ;;  %5826 = vmatprep.mubr.msk.f32.mxu1 %vm5913_vm1, %v5912_v2  ;;  %v5191_v14 = vld [vmem:[%s6615_s12] ss:$0 sm:$0xff] }
 0x748   :  { %5797 = vmatprep.subr.mxu0 %v5912_v2  ;;  %5827 = vmatmul.mubr.f32.vlgmr.msra.gmra.mxu1 %v6464_v30 }
 0x749   :  { %5798 = vmatpush3.msra.mxu0 %v4263_v15  ;;  %5805 = vmatprep.mubr.msk.f32.mxu0 %vm5913_vm1, %v5912_v2 }
 0x74a   :  { %5799 = vmatprep.subr.mxu0 %v5912_v2  ;;  %5836 = vmatprep.subr.mxu1 %v5912_v2 }
 0x74b   :  { %5800 = vmatpush3.msra.mxu0 %v4270_v22  ;;  %5840 = vmatprep.mubr.msk.f32.mxu1 %vm5913_vm1, %v5912_v2 }
 0x74c   :  { %5801 = vmatprep.subr.mxu0 %v5912_v2  ;;  %5837 = vmatpush3.msra.mxu1 %v4805_v5 }
 0x74d   :  { %5802 = vmatpush3.msra.mxu0 %v4277_v54  ;;  %5838 = vmatprep.subr.mxu1 %v5912_v2 }
 0x74e   :  { %5803 = vmatprep.subr.mxu0 %v5912_v2  ;;  %5839 = vmatpush3.msra.mxu1 %v4812_v56 }
 0x74f   :  { %5804 = vmatpush3.msra.mxu0 %v4284_v43  ;;  %5850 = vmatprep.subr.mxu1 %v5912_v2 }
 0x750   :  { %5806 = vmatmul.mubr.f32.vlgmr.msra.gmra.mxu0 %v6464_v30  ;;  %5829 = vmatprep.subr.mxu0 %v5912_v2 }
 0x751   :  { %5833 = vmatprep.mubr.msk.f32.mxu0 %vm5913_vm1, %v5912_v2  ;;  %5830 = vmatpush3.msra.mxu0 %v4724_v7 }
 0x752   :  { %5831 = vmatprep.subr.mxu0 %v5912_v2 }
 0x753   :  { %5832 = vmatpush3.msra.mxu0 %v4727_v41 }
 0x754   :  { %5843 = vmatprep.subr.mxu0 %v5912_v2 }
 0x7e2   :  { %v4323_v57 = vpop.f32.mrf.mxu1 }
 0x7e4   :  { %v5744_v58 = vpop.f32.mrf.mxu1 }
 0x7ea   :  { %v4207_v3 = vpop.f32.mrf.mxu0 }
 0x7eb   :  { %v4208_v22 = vadd.f32 %v5191_v14, %v4207_v3 }
 0x7ec   :  { %v5723_v4 = vpop.f32.mrf.mxu0 }
 0x7ed   :  { %v4324_v27 = vadd.f32 %v4323_v57, %v4208_v22 }
 0x7f4   :  { %v4495_v23 = vpop.f32.mrf.mxu1 }
 0x7f6   :  { %v5786_v15 = vpop.f32.mrf.mxu1 }
 0x7fd   :  { %v4413_v48 = vpop.f32.mrf.mxu0 }
 0x7fe   :  { %v4414_v43 = vadd.f32 %v4413_v48, %v4324_v27 }
 0x7ff   :  { %v5765_v16 = vpop.f32.mrf.mxu0 }
 0x800   :  { %v4496_v59 = vadd.f32 %v4495_v23, %v4414_v43 }
 0x808   :  { %v4673_v24 = vpop.f32.mrf.mxu1 }
 0x80a   :  { %v5828_v54 = vpop.f32.mrf.mxu1 }
 0x810   :  { %v4593_v60 = vpop.f32.mrf.mxu0 }
 0x811   :  { %v4594_v38 = vadd.f32 %v4593_v60, %v4496_v59 }
 0x812   :  { %v5807_v6 = vpop.f32.mrf.mxu0 }
 0x813   :  { %v4674_v61 = vadd.f32 %v4673_v24, %v4594_v38 }
 0x815   :  { %vm4677_vm0 = vcmp.ge.f32.partialorder %v4674_v61, 0.0  ;;  %v4678_v21 = vmul.f32 0.1, %v4674_v61 }
 0x817   :  { %v4679_v62 = vsel %vm4677_vm0, %v4674_v61, %v4678_v21 }
 0x818   :  { %v4690_v63 = vsel %vm549_vm4, %v4679_v62, 0 }
 0x819   :  { %v4762_v0 = vand.u32 4294901760, %v4690_v63 }
 0x81b   :  { %5841 = vmatmul.mubr.f32.vlgmr.msra.gmra.mxu1 %v4762_v0  ;;  %v4763_v8 = vsub.f32 %v4690_v63, %v4762_v0 }
 0x81c   :  { %5851 = vmatpush3.msra.mxu1 %v4724_v7  ;;  %5854 = vmatprep.mubr.msk.f32.mxu1 %vm5913_vm1, %v5912_v2 }
 0x81d   :  { %5852 = vmatprep.subr.mxu1 %v5912_v2  ;;  %v4764_v10 = vand.u32 4294901760, %v4763_v8 }
 0x81e   :  { %5853 = vmatpush3.msra.mxu1 %v4727_v41 }
 0x81f   :  { %5855 = vmatmul.mubr.f32.vlgmr.msra.gmra.mxu1 %v4764_v10  ;;  %5864 = vmatprep.subr.mxu1 %v5912_v2  ;;  %v4765_v13 = vsub.f32 %v4763_v8, %v4764_v10 }
 0x820   :  { %5865 = vmatpush3.msra.mxu1 %v4724_v7  ;;  %5868 = vmatprep.mubr.msk.f32.mxu1 %vm5913_vm1, %v5912_v2 }
 0x821   :  { %5866 = vmatprep.subr.mxu1 %v5912_v2  ;;  %v4766_v12 = vand.u32 4294901760, %v4765_v13 }
 0x822   :  { %5867 = vmatpush3.msra.mxu1 %v4727_v41 }
 0x823   :  { %5834 = vmatmul.mubr.f32.vlgmr.msra.gmra.mxu0 %v4766_v12  ;;  %5869 = vmatmul.mubr.f32.vlgmr.msra.gmra.mxu1 %v4762_v0 }
 0x824   :  { %5844 = vmatpush3.msra.mxu0 %v6570_v40  ;;  %5847 = vmatprep.mubr.msk.f32.mxu0 %vm5913_vm1, %v5912_v2 }
 0x825   :  { %5845 = vmatprep.subr.mxu0 %v5912_v2 }
 0x826   :  { %5846 = vmatpush3.msra.mxu0 %v4809_v31 }
 0x827   :  { %5848 = vmatmul.mubr.f32.vlgmr.msra.gmra.mxu0 %v4763_v8  ;;  %5857 = vmatprep.subr.mxu0 %v5912_v2 }
 0x828   :  { %5858 = vmatpush3.msra.mxu0 %v4803_v26  ;;  %5861 = vmatprep.mubr.msk.f32.mxu0 %vm5913_vm1, %v5912_v2 }
 0x829   :  { %5859 = vmatprep.subr.mxu0 %v5912_v2 }
 0x82a   :  { %5860 = vmatpush3.msra.mxu0 %v4810_v1 }
 0x82b   :  { %5862 = vmatmul.mubr.f32.vlgmr.msra.gmra.mxu0 %v4762_v0 }
 0x8db   :  { %v4849_v9 = vpop.f32.mrf.mxu1 }
 0x8dd   :  { %v5842_v47 = vpop.f32.mrf.mxu1 }
 0x8df   :  { %v5000_v17 = vpop.f32.mrf.mxu1 }
 0x8e1   :  { %v5856_v18 = vpop.f32.mrf.mxu1 }
 0x8e3   :  { %v4768_v20 = vpop.f32.mrf.mxu0  ;;  %v5150_v11 = vpop.f32.mrf.mxu1 }
 0x8e4   :  { %v4769_v25 = vadd.f32 %v5192_v19, %v4768_v20 }
 0x8e5   :  { %v5835_v32 = vpop.f32.mrf.mxu0  ;;  %v5870_v34 = vpop.f32.mrf.mxu1 }
 0x8e6   :  { %v4850_v35 = vadd.f32 %v4849_v9, %v4769_v25 }
 0x8e7   :  { %v4925_v42 = vpop.f32.mrf.mxu0 }
 0x8e8   :  { %v4926_v44 = vadd.f32 %v4925_v42, %v4850_v35 }
 0x8e9   :  { %v5849_v45 = vpop.f32.mrf.mxu0 }
 0x8ea   :  { %v5001_v2 = vadd.f32 %v5000_v17, %v4926_v44 }
 0x8eb   :  { %v5077_v46 = vpop.f32.mrf.mxu0 }
 0x8ec   :  { %v5078_v49 = vadd.f32 %v5077_v46, %v5001_v2 }
 0x8ed   :  { %v5863_v28 = vpop.f32.mrf.mxu0 }
 0x8ee   :  { %v5151_v29 = vadd.f32 %v5150_v11, %v5078_v49 }
 0x8f0   :  { %5154 = vst [vmem:[#allocation2] sm:$0xff] %v5151_v29 }
 0x8f1   :  { %5901 = shalt.err (!%p5898_p4)
}
 0x8f2   :  { %5164 = dma.vmem_to_hbm [thread:$0]  %s5162_s26, 128, %s6618_s15, [#allocation3]  }
 0x8f3   :  { %5910 = dma.done.wait [#allocation3], 128  }
 0x8f4   :  { %5911 = vsyncadd [#allocation3], 4294967168 }
 0x8f5   :  { %5168 = vsyncpa [#allocation3], 1 }

</bundles_post_ra>
